<compile_context>
chip_gen: v6e
topology: v6e:2x2x1
jax: 0.10.0
libtpu: 0.0.40
codegen_flags: <defaults>
</compile_context>

<pallas_src>
import functools

import jax
import jax.numpy as jnp
from jax.experimental import pallas as pl
from jax.experimental.pallas import tpu as pltpu

LATENT_DIFF_WEIGHT = 0.02
_SMALL_BYPASS_BYTES = 1 << 20          # < ~1 MiB: plain XLA reduce is faster
_TARGET_BLOCK_BYTES = 2 * 1024 * 1024  # ~2 MiB input tile per grid step


def _partial_sum_kernel(x_ref, o_ref, *, tb, valid_rows_last):
    """x_ref: (tb, cols) VMEM tile. o_ref: (1, 8, 128) per-block partial sum."""
    x = x_ref[...].astype(jnp.float32)
    if valid_rows_last != tb:
        # Ragged boundary block: rows >= valid are out-of-bounds garbage; zero them.
        i = pl.program_id(0)
        n = pl.num_programs(0)
        valid = jnp.where(i == n - 1, valid_rows_last, tb)
        row_ids = jax.lax.broadcasted_iota(jnp.int32, x.shape, 0)
        x = jnp.where(row_ids < valid, x, 0.0)
    partial = jnp.sum(x)
    o_ref[...] = jnp.full(o_ref.shape, partial, dtype=jnp.float32)


def latent_diff_loss(diff, *, weight=LATENT_DIFF_WEIGHT):
    """Returns dict {'latent_diff': scalar}, matching Latent_Diff.forward."""
    x = jnp.asarray(diff)
    n = int(x.size)
    if n == 0:
        return {"latent_diff": jnp.float32(0.0)}

    itemsize = jnp.dtype(x.dtype).itemsize
    if n * itemsize < _SMALL_BYPASS_BYTES:
        # Launch overhead would dominate; let XLA fuse the reduce into the graph.
        total = jnp.sum(x.astype(jnp.float32))
        return {"latent_diff": (total * jnp.float32(weight)).astype(jnp.float32)}

    flat = x.reshape(-1)

    # Pick a lane-dense column width that divides the element count (free reshape).
    cols = None
    for c in (1024, 512, 256, 128):
        if n % c == 0:
            cols = c
            break

    tail = jnp.float32(0.0)
    if cols is None:
        # Awkward element count: run the kernel on the lane-dense main chunk and
        # sum the (<1024-element) tail in plain JAX.
        cols = 1024
        main = (n // cols) * cols
        tail = jnp.sum(flat[main:].astype(jnp.float32))
        flat = flat[:main]
        n = main

    rows = n // cols
    x2d = flat.reshape(rows, cols)

    # Byte-sized row tile: ~2 MiB per block, multiple of 8 rows.
    row_bytes = cols * itemsize
    max_tb = max(8, ((_TARGET_BLOCK_BYTES // row_bytes) // 8) * 8)
    if rows <= max_tb:
        tb = rows                      # single block == full array dims
    else:
        tb = max_tb
    num_blocks = (rows + tb - 1) // tb
    valid_rows_last = rows - (num_blocks - 1) * tb

    block_bytes = tb * row_bytes
    vmem_limit = int(min(64 * 1024 * 1024, max(16 * 1024 * 1024, 4 * block_bytes)))

    kernel = functools.partial(
        _partial_sum_kernel, tb=tb, valid_rows_last=valid_rows_last
    )

    partials = pl.pallas_call(
        kernel,
        out_shape=jax.ShapeDtypeStruct((num_blocks, 8, 128), jnp.float32),
        grid=(num_blocks,),
        in_specs=[pl.BlockSpec((tb, cols), lambda i: (i, 0))],
        out_specs=pl.BlockSpec((1, 8, 128), lambda i: (i, 0, 0)),
        compiler_params=pltpu.CompilerParams(
            dimension_semantics=("parallel",),  # per-block partials -> megacore OK
            vmem_limit_bytes=vmem_limit,
        ),
    )(x2d)

    total = partials[:, 0, 0].sum() + tail
    return {"latent_diff": (total * jnp.float32(weight)).astype(jnp.float32)}


if __name__ == "__main__":
    k1, k2, k3 = jax.random.split(jax.random.PRNGKey(0), 3)

    def _check(arr, rtol, atol):
        out = jax.block_until_ready(latent_diff_loss(arr)["latent_diff"])
        ref = jnp.sum(arr.astype(jnp.float32)) * LATENT_DIFF_WEIGHT
        assert jnp.allclose(out, ref, rtol=rtol, atol=atol), (out, ref)

    # Small, module-consistent shape (batch=8 latent vectors of dim 32): bypass path.
    _check(jax.random.normal(k1, (8, 32), dtype=jnp.float32), 1e-5, 1e-6)

    # Lane-dense kernel path with a ragged last row-tile (masked in-kernel, 9 blocks).
    _check(jax.random.normal(k2, (4099, 1024), dtype=jnp.float32), 2e-3, 5e-2)

    # Awkward element count (not a multiple of 128): kernel on main chunk + tiny JAX tail.
    _check(jax.random.normal(k3, (1027, 333), dtype=jnp.float32), 2e-3, 5e-2)

    print("KERNEL_OK")
</pallas_src>

<mosaic_0001>
module attributes {stable_mosaic.version = 11 : i64} {
  func.func @_partial_sum_kernel(%arg0: i32, %arg1: memref<512x1024xf32, #tpu.memory_space<vmem>>, %arg2: memref<1x8x128xf32, #tpu.memory_space<vmem>>) attributes {dimension_semantics = [#tpu.dimension_semantics<parallel>], iteration_bounds = array<i64: 9>, scalar_prefetch = 0 : i64, scratch_operands = 0 : i64, tpu.core_type = #tpu.core_type<tc>, window_params = [{transform_indices = @transform_0, window_bounds = array<i64: 512, 1024>}, {transform_indices = @transform_1, window_bounds = array<i64: 1, 8, 128>}]} {
    %c0 = arith.constant 0 : index
    %c0_0 = arith.constant 0 : index
    %0 = vector.load %arg1[%c0, %c0_0] : memref<512x1024xf32, #tpu.memory_space<vmem>>, vector<512x1024xf32>
    %c8_i32 = arith.constant 8 : i32
    %1 = arith.cmpi eq, %arg0, %c8_i32 : i32
    %c3_i32 = arith.constant 3 : i32
    %c512_i32 = arith.constant 512 : i32
    %2 = arith.select %1, %c3_i32, %c512_i32 : i32
    %3 = tpu.iota {dimensions = array<i32: 0>} : vector<512x1024xi32>
    %4 = vector.broadcast %2 : i32 to vector<512x1024xi32>
    %5 = arith.cmpi slt, %3, %4 : vector<512x1024xi32>
    %cst = arith.constant 0.000000e+00 : f32
    %6 = vector.broadcast %cst : f32 to vector<512x1024xf32>
    %7 = arith.select %5, %0, %6 : vector<512x1024xi1>, vector<512x1024xf32>
    %8 = vector.shape_cast %7 : vector<512x1024xf32> to vector<1x512x1024xf32>
    %cst_1 = arith.constant dense<0.000000e+00> : vector<1xf32>
    %9 = vector.multi_reduction <add>, %8, %cst_1 [1, 2] : vector<1x512x1024xf32> to vector<1xf32>
    %10 = vector.shape_cast %9 : vector<1xf32> to vector<1x1x1xf32>
    %11 = vector.extract %10[0, 0, 0] : f32 from vector<1x1x1xf32>
    %12 = vector.broadcast %11 : f32 to vector<1x8x128xf32>
    %c0_2 = arith.constant 0 : index
    %c0_3 = arith.constant 0 : index
    %c0_4 = arith.constant 0 : index
    %13 = vector.load %arg2[%c0_2, %c0_3, %c0_4] : memref<1x8x128xf32, #tpu.memory_space<vmem>>, vector<1x8x128xf32>
    tpu.vector_store %arg2[%c0_2, %c0_3, %c0_4], %12 {strides = array<i32>} : memref<1x8x128xf32, #tpu.memory_space<vmem>>, vector<1x8x128xf32>,
    return
  }
  func.func @transform_0(%arg0: i32) -> (i32, i32) {
    %c0_i32 = arith.constant 0 : i32
    %c0_i32_0 = arith.constant 0 : i32
    return %arg0, %c0_i32 : i32, i32
  }
  func.func @transform_1(%arg0: i32) -> (i32, i32, i32) {
    %c0_i32 = arith.constant 0 : i32
    %c0_i32_0 = arith.constant 0 : i32
    %c0_i32_1 = arith.constant 0 : i32
    return %arg0, %c0_i32, %c0_i32_0 : i32, i32, i32
  }
}

</mosaic_0001>

<bundles_post_ra>
// kernel: tpu_custom_call.1
= control target key start
LH: loop header
LB: loop body
LE: loop exit
PB: predicated region body
PF: predicated region fallthrough
CT: control target
= control target key end

     0   :  { %6 = vsyncpa [#allocation3], 0  ;;  %s4159_s0 = inlined_call_operand.hbm [shape: f32[4099,1024], index: 0, kind: input, shape index: {}]   ;;  %s4160_s1 = inlined_call_operand.hbm [shape: f32[9,8,128], index: 1, kind: output, shape index: {}]  }
   0x1   :  { %8 = vsyncpa [#allocation3 + $0x1], 0 }
   0x2   :  { %9 = vsyncpa [#allocation4], 0 }
   0x3   :  { %11 = vsyncpa [#allocation4 + $0x1], 0  ;;  %s2083_s6 = smov 0   ;;  %s2085_s7 = smov 0  }
   0x4   :  { %s2087_s8 = smov 0   ;;  %s2089_s9 = smov 0  }
   0x5 LB: > { %s2104_s10 = sadd.s32 4294967295, %s2067_s9   ;;  %s1911_s11 = sadd.s32 4294967294, %s2067_s9   ;;  %s2067_s9 = sphi %s2089_s9, %s4298_s9   ;;  %s2063_s8 = sphi %s2087_s8, %s4297_s8   ;;  %s2059_s7 = sphi %s2085_s7, %s4296_s7   ;;  %s2055_s6 = sphi %s2083_s6, %s4295_s6  }
   0x6   : > { %s2108_s12 = sadd.s32 1, %s2067_s9   ;;  %s24_s13 = sadd.s32 1, %s2063_s8 }
   0x7   : > { %s21_s14 = ssub.s32 %s2067_s9, %s2108_s12  ;;  %p31_p0 = scmp.ne.s32.totalorder %s2063_s8, %s2059_s7 }
   0x8   : > { %p22_p1 = scmp.eq.s32.totalorder %s21_s14, 0  ;;  %p32_p2 = scmp.eq.s32.totalorder %s2067_s9, 0 }
   0x9   : > { %p37_p3 = scmp.ne.s32.totalorder %s2059_s7, %s2055_s6  ;;  %p38_p4 = scmp.eq.s32.totalorder %s2104_s10, 0 }
   0xa   : > { %s2120_s15 = scalar_select %p22_p1, %s2063_s8, %s24_s13  }
   0xb   : > { %p33_p5 = por %p32_p2, %p31_p0  ;;  %p2122_p6 = por %p38_p4, %p37_p3 }
   0xc   : > { %p4161_p7 = scmp.eq.s32.totalorder %s2104_s10, 8  ;;  %p67_p8 = scmp.eq.s32.totalorder %s1911_s11, 8 }
   0xd   : > { %p1913_p11 = scmp.ge.s32.totalorder %s2067_s9, 9 }
   0xe   : > { %p2129_p9 = por %p4161_p7, %p31_p0  ;;  %p2133_p10 = por %p67_p8, %p37_p3 }
   0xf   : > { %83 = sbr.rel (%p1913_p11) target bundleno = 52 (0x34), region = 16 }
  0x10   : > { %s4164_s18 = scalar_select %p2133_p10, 1, 0 }
  0x14   : > { %86 = sbr.rel (!%p33_p5) target bundleno = 52 (0x34), region = 20  ;;  %s87_s19 = sand.u32 (%p33_p5), 1, %s2063_s8  }
  0x15   : > { %s1915_s20 = sshll.u32 (%p33_p5), %s2067_s9, 6  ;;  %s1914_s21 = sshll.u32 (%p33_p5), %s87_s19, 12 }
  0x16   : > { %s93_s22 = ssub.s32 (%p33_p5), 513, %s1915_s20  ;;  %s2143_s25 = scalar_lea.sflag (%p33_p5), [#allocation3], %s87_s19 }
  0x17   : > { %p94_p12 = scmp.lt.s32.totalorder (%p33_p5), %s93_s22, 64  ;;  %s91_s26 = scalar_lea.vmem (%p33_p5), [#allocation2], %s1914_s21 }
  0x19   : > { %s4300_s22 = smov (!%p94_p12, %s93_s22), 64 }
  0x1a   : > { %s2140_s23 = sshll.u32 %s4300_s22, 10 }
  0x1b   : > { %s99_s24 = ssub.s32 65536, %s2140_s23 }
  0x1c   : > { %100 = vsyncadd %s2143_s25, %s99_s24  ;;  %p1918_p13 = scmp.ne.s32.totalorder %s2140_s23, 0  ;;  %s1932_s27 = sshll.u32 %s2067_s9, 16 }
  0x1d   : > { %s2151_s30 = scalar_lea.hbm %s4159_s0, %s1932_s27  ;;  %s106_s2 = sshll.u32 %s91_s26, 4  ;;  %s2153_s2 = int_to_ptr.vmem [resolvable:$true] %s106_s2 }
  0x1e   : > { %s1977_s3 = scalar_lea.hbm %s2151_s30, %s2140_s23  ;;  %s1981_s11 = scalar_lea.hbm %s4159_s0, 525312 }
  0x1f   : > { %p1978_p0 = scmp.ne.s32.totalorder %s2151_s30, %s1977_s3  ;;  %p1982_p3 = scmp.lt.s32.totalorder %s2151_s30, %s4159_s0 }
  0x20   : > { %p1983_p4 = scmp.lt.s32.totalorder %s1981_s11, %s1977_s3 }
  0x21   : > { %p1979_p1 = pnand %p1978_p0, %p1918_p13 }
  0x22   : > { %p1984_p5 = por %p1983_p4, %p1982_p3 }
  0x23   : > { %p1980_p2 = pneg %p1979_p1 }
  0x25   : > { %p1985_p8 = pnand %p1984_p5, %p1980_p2 }
  0x27   : > { %1988 = shalt.err (!%p1985_p8)
}
  0x28   : > { %s1989_s19 = scalar_lea.vmem %s2153_s2, %s2140_s23  ;;  %s2069_s20 = smov [#allocation2]  }
  0x29   : > { %p1990_p11 = scmp.ne.s32.totalorder %s2153_s2, %s1989_s19  ;;  %s1993_s21 = sshll.u32 %s2069_s20, 4  ;;  %s1994_s21 = int_to_ptr.vmem [resolvable:$false] %s1993_s21 }
  0x2a   : > { %s1995_s22 = scalar_lea.vmem %s1994_s21, 131072  ;;  %p1996_p1 = scmp.lt.s32.totalorder %s2153_s2, %s1994_s21 }
  0x2b   : > { %p1991_p12 = pnand %p1990_p11, %p1918_p13  ;;  %p1997_p7 = scmp.lt.s32.totalorder %s1995_s22, %s1989_s19 }
  0x2d   : > { %p1992_p0 = pneg %p1991_p12  ;;  %p1998_p10 = por %p1997_p7, %p1996_p1 }
  0x2f   : > { %p1999_p3 = pnand %p1998_p10, %p1992_p0 }
  0x31   : > { %2002 = shalt.err (!%p1999_p3)
}
  0x32   : > { %s2070_s24 = smov 1024   ;;  %s2071_s26 = smov 64  }
  0x33   : > { %112 = dma.hbm_to_vmem [thread:$0]  (%p1918_p13), %s2151_s30, %s2140_s23, %s2153_s2, %s2143_s25, %s2070_s24, %s2070_s24, %s2071_s26  }
  0x34 PF: > { %p1923_p2 = scmp.ge.s32.totalorder %s2067_s9, 1  ;;  %p114_p4 = scmp.lt.s32.totalorder %s2067_s9, 10 }
  0x36   : > { %p115_p5 = pnand %p1923_p2, %p114_p4 }
  0x37   : > { %s2182_s27 = sand.u32 (!%p115_p5), 1, %s2059_s7  }
  0x38   : > { %118 = sbr.rel (%p115_p5) target bundleno = 1305 (0x519), region = 24  ;;  %s1924_s28 = sshll.u32 (!%p115_p5), %s2182_s27, 12 }
  0x39   : > { %s121_s29 = scalar_lea.sflag (!%p115_p5), [#allocation3], %s2182_s27  ;;  %s2186_s3 = scalar_lea.vmem (!%p115_p5), [#allocation2], %s1924_s28 }
  0x3d   : > { %2046 = dma.done.wait (%p2122_p6), %s121_s29, 65536  }
  0x3e   : > { %2048 = vsyncadd (%p2122_p6), %s121_s29, 4294901760  ;;  %v663_v0 = vlaneseq  ;;  %p4165_p7 = scmp.eq.s32.totalorder %s2104_s10, 8  ;;  %v149_v3 = vld [vmem:[%s2186_s3] sm:$0xff]  ;;  %v150_v4 = vld [vmem:[%s2186_s3 + $0x8] sm:$0xff]  ;;  %s1925_s16 = sshll.u32 %s2182_s27, 3 }
  0x3f   : > { %v151_v5 = vld [vmem:[%s2186_s3 + $0x10] sm:$0xff]  ;;  %v152_v7 = vld [vmem:[%s2186_s3 + $0x18] sm:$0xff]  ;;  %v153_v11 = vld [vmem:[%s2186_s3 + $0x20] sm:$0xff]  ;;  %s1927_s25 = sshll.u32 %s2104_s10, 7  ;;  %s142_s30 = scalar_lea.vmem [#allocation5], %s1925_s16 }
  0x40   : > { %s662_s23 = scalar_select %p4165_p7, 3, 512  ;;  %v2194_v1 = vshrl.u32 %v663_v0, 7  ;;  %v154_v14 = vld [vmem:[%s2186_s3 + $0x28] sm:$0xff]  ;;  %v155_v17 = vld [vmem:[%s2186_s3 + $0x30] sm:$0xff]  ;;  %v156_v21 = vld [vmem:[%s2186_s3 + $0x38] sm:$0xff] }
  0x41   : > { %v157_v24 = vld [vmem:[%s2186_s3 + $0x40] sm:$0xff]  ;;  %v158_v28 = vld [vmem:[%s2186_s3 + $0x48] sm:$0xff]  ;;  %v159_v31 = vld [vmem:[%s2186_s3 + $0x50] sm:$0xff]  ;;  %s1841_s2 = sshll.u32 %s142_s30, 4  ;;  %s4123_s11 = scalar_lea.hbm %s4160_s1, %s1927_s25  ;;  %s1842_s2 = int_to_ptr.vmem [resolvable:$true] %s1841_s2 }
  0x42   : > { %v2196_v2 = vstv %s662_s23  ;;  %v665_v18 = vadd.s32 8, %v2194_v1  ;;  %v160_v36 = vld [vmem:[%s2186_s3 + $0x58] sm:$0xff]  ;;  %v161_v40 = vld [vmem:[%s2186_s3 + $0x60] sm:$0xff]  ;;  %v162_v43 = vld [vmem:[%s2186_s3 + $0x68] sm:$0xff]  ;;  %v666_v50 = vadd.s32 16, %v2194_v1  ;;  %s1828_s14 = scalar_lea.sflag [#allocation4], %s2182_s27 }
  0x43   : > { %vm2203_vm0 = vcmp.lt.s32.totalorder %v2194_v1, %v2196_v2  ;;  %v163_v46 = vld [vmem:[%s2186_s3 + $0x70] sm:$0xff]  ;;  %v164_v49 = vld [vmem:[%s2186_s3 + $0x78] sm:$0xff]  ;;  %v165_v53 = vld [vmem:[%s2186_s3 + $0x80] sm:$0xff]  ;;  %s2003_s19 = scalar_lea.vmem %s1842_s2, 128  ;;  %s2072_s20 = smov [#allocation5]  }
  0x44   : > { %v793_v8 = vsel %vm2203_vm0, %v149_v3, 0.0  ;;  %v794_v9 = vsel %vm2203_vm0, %v150_v4, 0.0  ;;  %v795_v10 = vsel %vm2203_vm0, %v151_v5, 0.0  ;;  %v796_v13 = vsel %vm2203_vm0, %v152_v7, 0.0  ;;  %v166_v57 = vld [vmem:[%s2186_s3 + $0x88] sm:$0xff]  ;;  %v167_v60 = vld [vmem:[%s2186_s3 + $0x90] sm:$0xff]  ;;  %p2004_p6 = scmp.ne.s32.totalorder %s1842_s2, %s2003_s19 }
  0x45   : > { %v1305_v12 = vadd.f32 %v794_v9, %v793_v8  ;;  %v797_v16 = vsel %vm2203_vm0, %v153_v11, 0.0  ;;  %v798_v20 = vsel %vm2203_vm0, %v154_v14, 0.0  ;;  %v799_v23 = vsel %vm2203_vm0, %v155_v17, 0.0  ;;  %v168_v63 = vld [vmem:[%s2186_s3 + $0x98] sm:$0xff]  ;;  %v169_v4 = vld [vmem:[%s2186_s3 + $0xa0] sm:$0xff]  ;;  %v170_v7 = vld [vmem:[%s2186_s3 + $0xa8] sm:$0xff] }
  0x46   : > { %vm2229_vm1 = vcmp.lt.s32.totalorder %v665_v18, %v2196_v2  ;;  %v800_v27 = vsel %vm2203_vm0, %v156_v21, 0.0  ;;  %vm2261_vm2 = vcmp.lt.s32.totalorder %v666_v50, %v2196_v2  ;;  %v667_v11 = vadd.s32 24, %v2194_v1  ;;  %v174_v18 = vld [vmem:[%s2186_s3 + $0xc8] sm:$0xff]  ;;  %v175_v21 = vld [vmem:[%s2186_s3 + $0xd0] sm:$0xff]  ;;  %v184_v50 = vld [vmem:[%s2186_s3 + $0x118] sm:$0xff]  ;;  %p2005_p10 = pnand %p2004_p6, %p2129_p9  ;;  %s2007_s21 = sshll.u32 %s2072_s20, 4  ;;  %s2008_s21 = int_to_ptr.vmem [resolvable:$false] %s2007_s21 }
  0x47   : > { %v1306_v15 = vadd.f32 %v1305_v12, %v795_v10  ;;  %v801_v30 = vsel %vm2229_vm1, %v157_v24, 0.0  ;;  %v802_v33 = vsel %vm2229_vm1, %v158_v28, 0.0  ;;  %v803_v35 = vsel %vm2229_vm1, %v159_v31, 0.0  ;;  %v171_v10 = vld [vmem:[%s2186_s3 + $0xb0] sm:$0xff]  ;;  %v172_v12 = vld [vmem:[%s2186_s3 + $0xb8] sm:$0xff]  ;;  %s2009_s10 = scalar_lea.vmem %s2008_s21, 256  ;;  %p2010_p8 = scmp.lt.s32.totalorder %s1842_s2, %s2008_s21 }
  0x48   : > { %v804_v39 = vsel %vm2229_vm1, %v160_v36, 0.0  ;;  %v805_v42 = vsel %vm2229_vm1, %v161_v40, 0.0  ;;  %v806_v45 = vsel %vm2229_vm1, %v162_v43, 0.0  ;;  %v807_v48 = vsel %vm2229_vm1, %v163_v46, 0.0  ;;  %v176_v24 = vld [vmem:[%s2186_s3 + $0xd8] sm:$0xff]  ;;  %v181_v40 = vld [vmem:[%s2186_s3 + $0x100] sm:$0xff]  ;;  %p2006_p13 = pneg %p2005_p10  ;;  %p2011_p11 = scmp.lt.s32.totalorder %s2009_s10, %s2003_s19 }
  0x49   : > { %v1307_v19 = vadd.f32 %v1306_v15, %v796_v13  ;;  %v808_v52 = vsel %vm2229_vm1, %v164_v49, 0.0  ;;  %v809_v56 = vsel %vm2261_vm2, %v165_v53, 0.0  ;;  %v810_v59 = vsel %vm2261_vm2, %v166_v57, 0.0  ;;  %v173_v15 = vld [vmem:[%s2186_s3 + $0xc0] sm:$0xff] }
  0x4a   : > { %v811_v62 = vsel %vm2261_vm2, %v167_v60, 0.0  ;;  %v812_v3 = vsel %vm2261_vm2, %v168_v63, 0.0  ;;  %v813_v6 = vsel %vm2261_vm2, %v169_v4, 0.0  ;;  %v814_v9 = vsel %vm2261_vm2, %v170_v7, 0.0  ;;  %v185_v53 = vld [vmem:[%s2186_s3 + $0x120] sm:$0xff]  ;;  %v188_v63 = vld [vmem:[%s2186_s3 + $0x138] sm:$0xff]  ;;  %p2012_p12 = por %p2011_p11, %p2010_p8 }
  0x4b   : > { %v1308_v22 = vadd.f32 %v1307_v19, %v797_v16  ;;  %v815_v14 = vsel %vm2261_vm2, %v171_v10, 0.0  ;;  %vm2289_vm3 = vcmp.lt.s32.totalorder %v667_v11, %v2196_v2  ;;  %v816_v17 = vsel %vm2261_vm2, %v172_v12, 0.0  ;;  %v189_v4 = vld [vmem:[%s2186_s3 + $0x140] sm:$0xff]  ;;  %v191_v11 = vld [vmem:[%s2186_s3 + $0x150] sm:$0xff] }
  0x4c   : > { %v669_v60 = vadd.s32 40, %v2194_v1  ;;  %p2013_p0 = pnand %p2012_p12, %p2006_p13 }
  0x4d   : > { %v1309_v26 = vadd.f32 %v1308_v22, %v798_v20  ;;  %v817_v20 = vsel %vm2289_vm3, %v173_v15, 0.0 }
  0x4e   : > { %vm2349_vm5 = vcmp.lt.s32.totalorder %v669_v60, %v2196_v2  ;;  %v206_v60 = vld [vmem:[%s2186_s3 + $0x1c8] sm:$0xff] }
  0x4f   : > { %v1310_v29 = vadd.f32 %v1309_v26, %v799_v23  ;;  %v818_v23 = vsel %vm2289_vm3, %v174_v18, 0.0  ;;  %v819_v26 = vsel %vm2289_vm3, %v175_v21, 0.0  ;;  %v833_v10 = vsel %vm2349_vm5, %v189_v4, 0.0 }
  0x50   : > { %v835_v16 = vsel %vm2349_vm5, %v191_v11, 0.0 }
  0x51   : > { %v1311_v32 = vadd.f32 %v1310_v29, %v800_v27  ;;  %v177_v27 = vld [vmem:[%s2186_s3 + $0xe0] sm:$0xff]  ;;  %v820_v29 = vsel %vm2289_vm3, %v176_v24, 0.0  ;;  %v670_v24 = vadd.s32 48, %v2194_v1 }
  0x53   : > { %v1312_v34 = vadd.f32 %v1311_v32, %v801_v30  ;;  %v178_v30 = vld [vmem:[%s2186_s3 + $0xe8] sm:$0xff]  ;;  %v821_v32 = vsel %vm2289_vm3, %v177_v27, 0.0  ;;  %v196_v27 = vld [vmem:[%s2186_s3 + $0x178] sm:$0xff]  ;;  %vm2379_vm6 = vcmp.lt.s32.totalorder %v670_v24, %v2196_v2 }
  0x54   : > { %v822_v36 = vsel %vm2289_vm3, %v178_v30, 0.0  ;;  %v197_v30 = vld [vmem:[%s2186_s3 + $0x180] sm:$0xff] }
  0x55   : > { %v1313_v37 = vadd.f32 %v1312_v34, %v802_v33  ;;  %v179_v33 = vld [vmem:[%s2186_s3 + $0xf0] sm:$0xff]  ;;  %v668_v34 = vadd.s32 32, %v2194_v1 }
  0x57   : > { %v1314_v38 = vadd.f32 %v1313_v37, %v803_v35  ;;  %v180_v37 = vld [vmem:[%s2186_s3 + $0xf8] sm:$0xff]  ;;  %vm2319_vm4 = vcmp.lt.s32.totalorder %v668_v34, %v2196_v2  ;;  %v198_v34 = vld [vmem:[%s2186_s3 + $0x188] sm:$0xff] }
  0x58   : > { %v824_v43 = vsel %vm2289_vm3, %v180_v37, 0.0  ;;  %v825_v46 = vsel %vm2319_vm4, %v181_v40, 0.0  ;;  %v832_v7 = vsel %vm2319_vm4, %v188_v63, 0.0  ;;  %v199_v37 = vld [vmem:[%s2186_s3 + $0x190] sm:$0xff]  ;;  %v200_v40 = vld [vmem:[%s2186_s3 + $0x198] sm:$0xff] }
  0x59   : > { %v1315_v41 = vadd.f32 %v1314_v38, %v804_v39  ;;  %v823_v39 = vsel %vm2289_vm3, %v179_v33, 0.0  ;;  %v840_v33 = vsel %vm2349_vm5, %v196_v27, 0.0  ;;  %v207_v63 = vld [vmem:[%s2186_s3 + $0x1d0] sm:$0xff]  ;;  %v214_v27 = vld [vmem:[%s2186_s3 + $0x208] sm:$0xff] }
  0x5b   : > { %v1316_v44 = vadd.f32 %v1315_v41, %v805_v42 }
  0x5d   : > { %v1317_v47 = vadd.f32 %v1316_v44, %v806_v45  ;;  %v182_v44 = vld [vmem:[%s2186_s3 + $0x108] sm:$0xff] }
  0x5e   : > { %v826_v49 = vsel %vm2319_vm4, %v182_v44, 0.0 }
  0x5f   : > { %v1318_v51 = vadd.f32 %v1317_v47, %v807_v48  ;;  %v183_v47 = vld [vmem:[%s2186_s3 + $0x110] sm:$0xff] }
  0x61   : > { %v1319_v55 = vadd.f32 %v1318_v51, %v808_v52  ;;  %v827_v52 = vsel %vm2319_vm4, %v183_v47, 0.0 }
  0x63   : > { %v1320_v58 = vadd.f32 %v1319_v55, %v809_v56  ;;  %v828_v55 = vsel %vm2319_vm4, %v184_v50, 0.0  ;;  %v186_v56 = vld [vmem:[%s2186_s3 + $0x128] sm:$0xff]  ;;  %v671_v50 = vadd.s32 56, %v2194_v1 }
  0x65   : > { %v1321_v61 = vadd.f32 %v1320_v58, %v810_v59  ;;  %v829_v58 = vsel %vm2319_vm4, %v185_v53, 0.0  ;;  %v187_v59 = vld [vmem:[%s2186_s3 + $0x130] sm:$0xff]  ;;  %v204_v53 = vld [vmem:[%s2186_s3 + $0x1b8] sm:$0xff]  ;;  %vm2409_vm7 = vcmp.lt.s32.totalorder %v671_v50, %v2196_v2 }
  0x67   : > { %v1322_v0 = vadd.f32 %v1321_v61, %v811_v62  ;;  %v830_v62 = vsel %vm2319_vm4, %v186_v56, 0.0  ;;  %v205_v56 = vld [vmem:[%s2186_s3 + $0x1c0] sm:$0xff] }
  0x69   : > { %v1323_v5 = vadd.f32 %v1322_v0, %v812_v3  ;;  %v831_v3 = vsel %vm2319_vm4, %v187_v59, 0.0  ;;  %v848_v59 = vsel %vm2379_vm6, %v204_v53, 0.0  ;;  %v222_v53 = vld [vmem:[%s2186_s3 + $0x248] sm:$0xff] }
  0x6b   : > { %v1324_v8 = vadd.f32 %v1323_v5, %v813_v6  ;;  %v851_v5 = vsel %vm2409_vm7, %v207_v63, 0.0 }
  0x6d   : > { %v1325_v13 = vadd.f32 %v1324_v8, %v814_v9  ;;  %v190_v8 = vld [vmem:[%s2186_s3 + $0x148] sm:$0xff] }
  0x6f   : > { %v1326_v19 = vadd.f32 %v1325_v13, %v815_v14  ;;  %v834_v13 = vsel %vm2349_vm5, %v190_v8, 0.0  ;;  %v192_v14 = vld [vmem:[%s2186_s3 + $0x158] sm:$0xff] }
  0x71   : > { %v1327_v22 = vadd.f32 %v1326_v19, %v816_v17  ;;  %v193_v17 = vld [vmem:[%s2186_s3 + $0x160] sm:$0xff]  ;;  %v836_v19 = vsel %vm2349_vm5, %v192_v14, 0.0 }
  0x73   : > { %v1328_v25 = vadd.f32 %v1327_v22, %v817_v20  ;;  %v194_v20 = vld [vmem:[%s2186_s3 + $0x168] sm:$0xff]  ;;  %v837_v22 = vsel %vm2349_vm5, %v193_v17, 0.0 }
  0x75   : > { %v1329_v28 = vadd.f32 %v1328_v25, %v818_v23  ;;  %v195_v23 = vld [vmem:[%s2186_s3 + $0x170] sm:$0xff] }
  0x77   : > { %v1330_v31 = vadd.f32 %v1329_v28, %v819_v26  ;;  %v838_v26 = vsel %vm2349_vm5, %v194_v20, 0.0  ;;  %v672_v20 = vadd.s32 64, %v2194_v1 }
  0x79   : > { %v1331_v35 = vadd.f32 %v1330_v31, %v820_v29  ;;  %v839_v29 = vsel %vm2349_vm5, %v195_v23, 0.0  ;;  %v213_v23 = vld [vmem:[%s2186_s3 + $0x200] sm:$0xff]  ;;  %vm2441_vm8 = vcmp.lt.s32.totalorder %v672_v20, %v2196_v2  ;;  %v232_v20 = vld [vmem:[%s2186_s3 + $0x298] sm:$0xff] }
  0x7b   : > { %v1332_v38 = vadd.f32 %v1331_v35, %v821_v32 }
  0x7d   : > { %v1333_v42 = vadd.f32 %v1332_v38, %v822_v36  ;;  %v841_v36 = vsel %vm2379_vm6, %v197_v30, 0.0  ;;  %v215_v30 = vld [vmem:[%s2186_s3 + $0x210] sm:$0xff] }
  0x7f   : > { %v1334_v45 = vadd.f32 %v1333_v42, %v823_v39  ;;  %v842_v39 = vsel %vm2379_vm6, %v198_v34, 0.0  ;;  %v843_v42 = vsel %vm2379_vm6, %v199_v37, 0.0 }
  0x81   : > { %v1335_v48 = vadd.f32 %v1334_v45, %v824_v43  ;;  %v201_v43 = vld [vmem:[%s2186_s3 + $0x1a0] sm:$0xff]  ;;  %v844_v45 = vsel %vm2379_vm6, %v200_v40, 0.0 }
  0x83   : > { %v1336_v51 = vadd.f32 %v1335_v48, %v825_v46  ;;  %v202_v46 = vld [vmem:[%s2186_s3 + $0x1a8] sm:$0xff]  ;;  %v845_v48 = vsel %vm2379_vm6, %v201_v43, 0.0 }
  0x85   : > { %v1337_v54 = vadd.f32 %v1336_v51, %v826_v49  ;;  %v203_v49 = vld [vmem:[%s2186_s3 + $0x1b0] sm:$0xff] }
  0x87   : > { %v1338_v57 = vadd.f32 %v1337_v54, %v827_v52  ;;  %v846_v52 = vsel %vm2379_vm6, %v202_v46, 0.0  ;;  %v673_v46 = vadd.s32 72, %v2194_v1 }
  0x89   : > { %v1339_v61 = vadd.f32 %v1338_v57, %v828_v55  ;;  %v847_v55 = vsel %vm2379_vm6, %v203_v49, 0.0  ;;  %v221_v49 = vld [vmem:[%s2186_s3 + $0x240] sm:$0xff]  ;;  %vm2471_vm9 = vcmp.lt.s32.totalorder %v673_v46, %v2196_v2  ;;  %v224_v57 = vld [vmem:[%s2186_s3 + $0x258] sm:$0xff] }
  0x8a   : > { %v240_v46 = vld [vmem:[%s2186_s3 + $0x2d8] sm:$0xff] }
  0x8b   : > { %v1340_v0 = vadd.f32 %v1339_v61, %v829_v58 }
  0x8d   : > { %v1341_v6 = vadd.f32 %v1340_v0, %v830_v62  ;;  %v849_v62 = vsel %vm2409_vm7, %v205_v56, 0.0  ;;  %v866_v56 = vsel %vm2471_vm9, %v222_v53, 0.0 }
  0x8f   : > { %v1342_v9 = vadd.f32 %v1341_v6, %v831_v3  ;;  %v850_v3 = vsel %vm2409_vm7, %v206_v60, 0.0  ;;  %v208_v6 = vld [vmem:[%s2186_s3 + $0x1d8] sm:$0xff] }
  0x91   : > { %v1343_v12 = vadd.f32 %v1342_v9, %v832_v7  ;;  %v852_v9 = vsel %vm2409_vm7, %v208_v6, 0.0 }
  0x93   : > { %v1344_v15 = vadd.f32 %v1343_v12, %v833_v10  ;;  %v209_v10 = vld [vmem:[%s2186_s3 + $0x1e0] sm:$0xff] }
  0x94   : > { %v853_v12 = vsel %vm2409_vm7, %v209_v10, 0.0  ;;  %v229_v10 = vld [vmem:[%s2186_s3 + $0x280] sm:$0xff] }
  0x95   : > { %v1345_v18 = vadd.f32 %v1344_v15, %v834_v13  ;;  %v210_v13 = vld [vmem:[%s2186_s3 + $0x1e8] sm:$0xff] }
  0x96   : > { %v854_v15 = vsel %vm2409_vm7, %v210_v13, 0.0 }
  0x97   : > { %v1346_v21 = vadd.f32 %v1345_v18, %v835_v16  ;;  %v211_v16 = vld [vmem:[%s2186_s3 + $0x1f0] sm:$0xff] }
  0x98   : > { %v855_v18 = vsel %vm2409_vm7, %v211_v16, 0.0 }
  0x99   : > { %v1347_v25 = vadd.f32 %v1346_v21, %v836_v19  ;;  %v212_v19 = vld [vmem:[%s2186_s3 + $0x1f8] sm:$0xff] }
  0x9b   : > { %v1348_v28 = vadd.f32 %v1347_v25, %v837_v22  ;;  %v856_v22 = vsel %vm2409_vm7, %v212_v19, 0.0 }
  0x9d   : > { %v1349_v32 = vadd.f32 %v1348_v28, %v838_v26  ;;  %v857_v26 = vsel %vm2441_vm8, %v213_v23, 0.0  ;;  %v233_v23 = vld [vmem:[%s2186_s3 + $0x2a0] sm:$0xff] }
  0x9f   : > { %v1350_v35 = vadd.f32 %v1349_v32, %v839_v29  ;;  %v858_v29 = vsel %vm2441_vm8, %v214_v27, 0.0  ;;  %v859_v32 = vsel %vm2441_vm8, %v215_v30, 0.0  ;;  %v675_v30 = vadd.s32 88, %v2194_v1 }
  0xa1   : > { %v1351_v38 = vadd.f32 %v1350_v35, %v840_v33  ;;  %v216_v33 = vld [vmem:[%s2186_s3 + $0x218] sm:$0xff]  ;;  %vm2529_vm11 = vcmp.lt.s32.totalorder %v675_v30, %v2196_v2  ;;  %v254_v30 = vld [vmem:[%s2186_s3 + $0x348] sm:$0xff] }
  0xa2   : > { %v860_v35 = vsel %vm2441_vm8, %v216_v33, 0.0  ;;  %v236_v33 = vld [vmem:[%s2186_s3 + $0x2b8] sm:$0xff] }
  0xa3   : > { %v1352_v41 = vadd.f32 %v1351_v38, %v841_v36  ;;  %v217_v36 = vld [vmem:[%s2186_s3 + $0x220] sm:$0xff] }
  0xa4   : > { %v861_v38 = vsel %vm2441_vm8, %v217_v36, 0.0  ;;  %v237_v36 = vld [vmem:[%s2186_s3 + $0x2c0] sm:$0xff] }
  0xa5   : > { %v1353_v44 = vadd.f32 %v1352_v41, %v842_v39  ;;  %v218_v39 = vld [vmem:[%s2186_s3 + $0x228] sm:$0xff] }
  0xa6   : > { %v862_v41 = vsel %vm2441_vm8, %v218_v39, 0.0 }
  0xa7   : > { %v1354_v47 = vadd.f32 %v1353_v44, %v843_v42  ;;  %v219_v42 = vld [vmem:[%s2186_s3 + $0x230] sm:$0xff] }
  0xa8   : > { %v863_v44 = vsel %vm2441_vm8, %v219_v42, 0.0  ;;  %v881_v42 = vsel %vm2529_vm11, %v237_v36, 0.0  ;;  %v256_v36 = vld [vmem:[%s2186_s3 + $0x358] sm:$0xff] }
  0xa9   : > { %v1355_v51 = vadd.f32 %v1354_v47, %v844_v45  ;;  %v220_v45 = vld [vmem:[%s2186_s3 + $0x238] sm:$0xff] }
  0xab   : > { %v1356_v54 = vadd.f32 %v1355_v51, %v845_v48  ;;  %v864_v48 = vsel %vm2441_vm8, %v220_v45, 0.0 }
  0xad   : > { %v1357_v58 = vadd.f32 %v1356_v54, %v846_v52  ;;  %v865_v52 = vsel %vm2471_vm9, %v221_v49, 0.0  ;;  %v223_v54 = vld [vmem:[%s2186_s3 + $0x250] sm:$0xff]  ;;  %v241_v49 = vld [vmem:[%s2186_s3 + $0x2e0] sm:$0xff] }
  0xaf   : > { %v1358_v61 = vadd.f32 %v1357_v58, %v847_v55  ;;  %v867_v58 = vsel %vm2471_vm9, %v223_v54, 0.0  ;;  %v885_v54 = vsel %vm2529_vm11, %v241_v49, 0.0  ;;  %v260_v49 = vld [vmem:[%s2186_s3 + $0x378] sm:$0xff] }
  0xb1   : > { %v1359_v0 = vadd.f32 %v1358_v61, %v848_v59  ;;  %v225_v59 = vld [vmem:[%s2186_s3 + $0x260] sm:$0xff]  ;;  %v868_v61 = vsel %vm2471_vm9, %v224_v57, 0.0 }
  0xb3   : > { %v1360_v4 = vadd.f32 %v1359_v0, %v849_v62  ;;  %v226_v62 = vld [vmem:[%s2186_s3 + $0x268] sm:$0xff]  ;;  %v869_v0 = vsel %vm2471_vm9, %v225_v59, 0.0  ;;  %v244_v59 = vld [vmem:[%s2186_s3 + $0x2f8] sm:$0xff] }
  0xb4   : > { %v870_v6 = vsel %vm2471_vm9, %v226_v62, 0.0  ;;  %v245_v62 = vld [vmem:[%s2186_s3 + $0x300] sm:$0xff] }
  0xb5   : > { %v1361_v7 = vadd.f32 %v1360_v4, %v850_v3  ;;  %v227_v3 = vld [vmem:[%s2186_s3 + $0x270] sm:$0xff]  ;;  %v674_v4 = vadd.s32 80, %v2194_v1 }
  0xb7   : > { %v1362_v8 = vadd.f32 %v1361_v7, %v851_v5  ;;  %v228_v7 = vld [vmem:[%s2186_s3 + $0x278] sm:$0xff]  ;;  %vm2499_vm10 = vcmp.lt.s32.totalorder %v674_v4, %v2196_v2  ;;  %v246_v4 = vld [vmem:[%s2186_s3 + $0x308] sm:$0xff] }
  0xb8   : > { %v872_v13 = vsel %vm2471_vm9, %v228_v7, 0.0  ;;  %v873_v16 = vsel %vm2499_vm10, %v229_v10, 0.0  ;;  %v880_v39 = vsel %vm2499_vm10, %v236_v33, 0.0  ;;  %v247_v7 = vld [vmem:[%s2186_s3 + $0x310] sm:$0xff]  ;;  %v248_v10 = vld [vmem:[%s2186_s3 + $0x318] sm:$0xff] }
  0xb9   : > { %v1363_v11 = vadd.f32 %v1362_v8, %v852_v9  ;;  %v871_v9 = vsel %vm2471_vm9, %v227_v3, 0.0  ;;  %v888_v3 = vsel %vm2529_vm11, %v244_v59, 0.0  ;;  %v255_v33 = vld [vmem:[%s2186_s3 + $0x350] sm:$0xff] }
  0xba   : > { %v263_v59 = vld [vmem:[%s2186_s3 + $0x390] sm:$0xff] }
  0xbb   : > { %v1364_v14 = vadd.f32 %v1363_v11, %v853_v12 }
  0xbd   : > { %v1365_v17 = vadd.f32 %v1364_v14, %v854_v15  ;;  %v230_v14 = vld [vmem:[%s2186_s3 + $0x288] sm:$0xff] }
  0xbe   : > { %v874_v19 = vsel %vm2499_vm10, %v230_v14, 0.0 }
  0xbf   : > { %v1366_v21 = vadd.f32 %v1365_v17, %v855_v18  ;;  %v231_v17 = vld [vmem:[%s2186_s3 + $0x290] sm:$0xff] }
  0xc1   : > { %v1367_v25 = vadd.f32 %v1366_v21, %v856_v22  ;;  %v875_v22 = vsel %vm2499_vm10, %v231_v17, 0.0 }
  0xc3   : > { %v1368_v28 = vadd.f32 %v1367_v25, %v857_v26  ;;  %v876_v25 = vsel %vm2499_vm10, %v232_v20, 0.0  ;;  %v234_v26 = vld [vmem:[%s2186_s3 + $0x2a8] sm:$0xff]  ;;  %v677_v20 = vadd.s32 104, %v2194_v1 }
  0xc5   : > { %v1369_v31 = vadd.f32 %v1368_v28, %v858_v29  ;;  %v877_v28 = vsel %vm2499_vm10, %v233_v23, 0.0  ;;  %v235_v29 = vld [vmem:[%s2186_s3 + $0x2b0] sm:$0xff]  ;;  %v252_v23 = vld [vmem:[%s2186_s3 + $0x338] sm:$0xff]  ;;  %vm2589_vm13 = vcmp.lt.s32.totalorder %v677_v20, %v2196_v2  ;;  %v270_v20 = vld [vmem:[%s2186_s3 + $0x3c8] sm:$0xff] }
  0xc7   : > { %v1370_v34 = vadd.f32 %v1369_v31, %v859_v32  ;;  %v878_v32 = vsel %vm2499_vm10, %v234_v26, 0.0  ;;  %v253_v26 = vld [vmem:[%s2186_s3 + $0x340] sm:$0xff] }
  0xc9   : > { %v1371_v37 = vadd.f32 %v1370_v34, %v860_v35  ;;  %v879_v35 = vsel %vm2499_vm10, %v235_v29, 0.0 }
  0xcb   : > { %v1372_v40 = vadd.f32 %v1371_v37, %v861_v38 }
  0xcd   : > { %v1373_v43 = vadd.f32 %v1372_v40, %v862_v41  ;;  %v238_v40 = vld [vmem:[%s2186_s3 + $0x2c8] sm:$0xff] }
  0xce   : > { %v882_v45 = vsel %vm2529_vm11, %v238_v40, 0.0 }
  0xcf   : > { %v1374_v47 = vadd.f32 %v1373_v43, %v863_v44  ;;  %v239_v43 = vld [vmem:[%s2186_s3 + $0x2d0] sm:$0xff] }
  0xd1   : > { %v1375_v51 = vadd.f32 %v1374_v47, %v864_v48  ;;  %v883_v48 = vsel %vm2529_vm11, %v239_v43, 0.0 }
  0xd3   : > { %v1376_v55 = vadd.f32 %v1375_v51, %v865_v52  ;;  %v884_v51 = vsel %vm2529_vm11, %v240_v46, 0.0  ;;  %v242_v52 = vld [vmem:[%s2186_s3 + $0x2e8] sm:$0xff]  ;;  %v678_v46 = vadd.s32 112, %v2194_v1 }
  0xd5   : > { %v1377_v60 = vadd.f32 %v1376_v55, %v866_v56  ;;  %v243_v55 = vld [vmem:[%s2186_s3 + $0x2f0] sm:$0xff]  ;;  %v676_v56 = vadd.s32 96, %v2194_v1  ;;  %vm2619_vm14 = vcmp.lt.s32.totalorder %v678_v46, %v2196_v2  ;;  %v278_v46 = vld [vmem:[%s2186_s3 + $0x408] sm:$0xff] }
  0xd7   : > { %v1378_v63 = vadd.f32 %v1377_v60, %v867_v58  ;;  %v886_v58 = vsel %vm2529_vm11, %v242_v52, 0.0  ;;  %vm2559_vm12 = vcmp.lt.s32.totalorder %v676_v56, %v2196_v2  ;;  %v261_v52 = vld [vmem:[%s2186_s3 + $0x380] sm:$0xff]  ;;  %v262_v56 = vld [vmem:[%s2186_s3 + $0x388] sm:$0xff] }
  0xd8   : > { %v896_v29 = vsel %vm2559_vm12, %v252_v23, 0.0  ;;  %v271_v23 = vld [vmem:[%s2186_s3 + $0x3d0] sm:$0xff] }
  0xd9   : > { %v1379_v5 = vadd.f32 %v1378_v63, %v868_v61  ;;  %v887_v61 = vsel %vm2529_vm11, %v243_v55, 0.0  ;;  %v904_v55 = vsel %vm2589_vm13, %v260_v49, 0.0  ;;  %v279_v49 = vld [vmem:[%s2186_s3 + $0x410] sm:$0xff] }
  0xdb   : > { %v1380_v8 = vadd.f32 %v1379_v5, %v869_v0 }
  0xdd   : > { %v1381_v12 = vadd.f32 %v1380_v8, %v870_v6  ;;  %v889_v6 = vsel %vm2559_vm12, %v245_v62, 0.0  ;;  %v264_v62 = vld [vmem:[%s2186_s3 + $0x398] sm:$0xff] }
  0xdf   : > { %v1382_v15 = vadd.f32 %v1381_v12, %v871_v9  ;;  %v890_v9 = vsel %vm2559_vm12, %v246_v4, 0.0  ;;  %v891_v12 = vsel %vm2559_vm12, %v247_v7, 0.0 }
  0xe1   : > { %v1383_v18 = vadd.f32 %v1382_v15, %v872_v13  ;;  %v249_v13 = vld [vmem:[%s2186_s3 + $0x320] sm:$0xff]  ;;  %v892_v15 = vsel %vm2559_vm12, %v248_v10, 0.0  ;;  %v679_v10 = vadd.s32 120, %v2194_v1 }
  0xe3   : > { %v1384_v21 = vadd.f32 %v1383_v18, %v873_v16  ;;  %v250_v16 = vld [vmem:[%s2186_s3 + $0x328] sm:$0xff]  ;;  %v893_v18 = vsel %vm2559_vm12, %v249_v13, 0.0  ;;  %v268_v13 = vld [vmem:[%s2186_s3 + $0x3b8] sm:$0xff]  ;;  %vm2649_vm15 = vcmp.lt.s32.totalorder %v679_v10, %v2196_v2 }
  0xe4   : > { %v286_v10 = vld [vmem:[%s2186_s3 + $0x448] sm:$0xff] }
  0xe5   : > { %v1385_v24 = vadd.f32 %v1384_v21, %v874_v19  ;;  %v251_v19 = vld [vmem:[%s2186_s3 + $0x330] sm:$0xff] }
  0xe7   : > { %v1386_v27 = vadd.f32 %v1385_v24, %v875_v22  ;;  %v894_v22 = vsel %vm2559_vm12, %v250_v16, 0.0  ;;  %v269_v16 = vld [vmem:[%s2186_s3 + $0x3c0] sm:$0xff] }
  0xe9   : > { %v1387_v31 = vadd.f32 %v1386_v27, %v876_v25  ;;  %v895_v25 = vsel %vm2559_vm12, %v251_v19, 0.0  ;;  %v912_v19 = vsel %vm2619_vm14, %v268_v13, 0.0  ;;  %v287_v13 = vld [vmem:[%s2186_s3 + $0x450] sm:$0xff] }
  0xeb   : > { %v1388_v34 = vadd.f32 %v1387_v31, %v877_v28 }
  0xed   : > { %v1389_v38 = vadd.f32 %v1388_v34, %v878_v32  ;;  %v897_v32 = vsel %vm2589_vm13, %v253_v26, 0.0  ;;  %v272_v26 = vld [vmem:[%s2186_s3 + $0x3d8] sm:$0xff] }
  0xef   : > { %v1390_v41 = vadd.f32 %v1389_v38, %v879_v35  ;;  %v898_v35 = vsel %vm2589_vm13, %v254_v30, 0.0  ;;  %v899_v38 = vsel %vm2589_vm13, %v255_v33, 0.0 }
  0xf1   : > { %v1391_v44 = vadd.f32 %v1390_v41, %v880_v39  ;;  %v257_v39 = vld [vmem:[%s2186_s3 + $0x360] sm:$0xff]  ;;  %v900_v41 = vsel %vm2589_vm13, %v256_v36, 0.0  ;;  %v680_v36 = vadd.s32 128, %v2194_v1 }
  0xf3   : > { %v1392_v47 = vadd.f32 %v1391_v44, %v881_v42  ;;  %v258_v42 = vld [vmem:[%s2186_s3 + $0x368] sm:$0xff]  ;;  %v901_v44 = vsel %vm2589_vm13, %v257_v39, 0.0  ;;  %v276_v39 = vld [vmem:[%s2186_s3 + $0x3f8] sm:$0xff]  ;;  %vm2679_vm0 = vcmp.lt.s32.totalorder %v680_v36, %v2196_v2 }
  0xf4   : > { %v294_v36 = vld [vmem:[%s2186_s3 + $0x488] sm:$0xff] }
  0xf5   : > { %v1393_v50 = vadd.f32 %v1392_v47, %v882_v45  ;;  %v259_v45 = vld [vmem:[%s2186_s3 + $0x370] sm:$0xff] }
  0xf7   : > { %v1394_v53 = vadd.f32 %v1393_v50, %v883_v48  ;;  %v902_v48 = vsel %vm2589_vm13, %v258_v42, 0.0  ;;  %v277_v42 = vld [vmem:[%s2186_s3 + $0x400] sm:$0xff] }
  0xf9   : > { %v1395_v57 = vadd.f32 %v1394_v53, %v884_v51  ;;  %v903_v51 = vsel %vm2589_vm13, %v259_v45, 0.0  ;;  %v920_v45 = vsel %vm2649_vm15, %v276_v39, 0.0  ;;  %v295_v39 = vld [vmem:[%s2186_s3 + $0x490] sm:$0xff] }
  0xfb   : > { %v1396_v60 = vadd.f32 %v1395_v57, %v885_v54 }
  0xfd   : > { %v1397_v0 = vadd.f32 %v1396_v60, %v886_v58  ;;  %v905_v58 = vsel %vm2619_vm14, %v261_v52, 0.0  ;;  %v280_v52 = vld [vmem:[%s2186_s3 + $0x418] sm:$0xff] }
  0xff   : > { %v1398_v5 = vadd.f32 %v1397_v0, %v887_v61  ;;  %v906_v61 = vsel %vm2619_vm14, %v262_v56, 0.0  ;;  %v907_v0 = vsel %vm2619_vm14, %v263_v59, 0.0 }
 0x101   : > { %v1399_v8 = vadd.f32 %v1398_v5, %v888_v3  ;;  %v265_v3 = vld [vmem:[%s2186_s3 + $0x3a0] sm:$0xff]  ;;  %v908_v5 = vsel %vm2619_vm14, %v264_v62, 0.0  ;;  %v681_v62 = vadd.s32 136, %v2194_v1 }
 0x103   : > { %v1400_v11 = vadd.f32 %v1399_v8, %v889_v6  ;;  %v266_v6 = vld [vmem:[%s2186_s3 + $0x3a8] sm:$0xff]  ;;  %v909_v8 = vsel %vm2619_vm14, %v265_v3, 0.0  ;;  %v284_v3 = vld [vmem:[%s2186_s3 + $0x438] sm:$0xff]  ;;  %vm2709_vm1 = vcmp.lt.s32.totalorder %v681_v62, %v2196_v2 }
 0x104   : > { %v302_v62 = vld [vmem:[%s2186_s3 + $0x4c8] sm:$0xff] }
 0x105   : > { %v1401_v14 = vadd.f32 %v1400_v11, %v890_v9  ;;  %v267_v9 = vld [vmem:[%s2186_s3 + $0x3b0] sm:$0xff] }
 0x107   : > { %v1402_v17 = vadd.f32 %v1401_v14, %v891_v12  ;;  %v910_v12 = vsel %vm2619_vm14, %v266_v6, 0.0  ;;  %v285_v6 = vld [vmem:[%s2186_s3 + $0x440] sm:$0xff] }
 0x109   : > { %v1403_v21 = vadd.f32 %v1402_v17, %v892_v15  ;;  %v911_v15 = vsel %vm2619_vm14, %v267_v9, 0.0  ;;  %v928_v9 = vsel %vm2679_vm0, %v284_v3, 0.0  ;;  %v303_v3 = vld [vmem:[%s2186_s3 + $0x4d0] sm:$0xff] }
 0x10b   : > { %v1404_v24 = vadd.f32 %v1403_v21, %v893_v18 }
 0x10d   : > { %v1405_v28 = vadd.f32 %v1404_v24, %v894_v22  ;;  %v913_v22 = vsel %vm2649_vm15, %v269_v16, 0.0  ;;  %v288_v16 = vld [vmem:[%s2186_s3 + $0x458] sm:$0xff] }
 0x10f   : > { %v1406_v31 = vadd.f32 %v1405_v28, %v895_v25  ;;  %v914_v25 = vsel %vm2649_vm15, %v270_v20, 0.0  ;;  %v915_v28 = vsel %vm2649_vm15, %v271_v23, 0.0 }
 0x111   : > { %v1407_v34 = vadd.f32 %v1406_v31, %v896_v29  ;;  %v273_v29 = vld [vmem:[%s2186_s3 + $0x3e0] sm:$0xff]  ;;  %v916_v31 = vsel %vm2649_vm15, %v272_v26, 0.0  ;;  %v682_v26 = vadd.s32 144, %v2194_v1 }
 0x113   : > { %v1408_v37 = vadd.f32 %v1407_v34, %v897_v32  ;;  %v274_v32 = vld [vmem:[%s2186_s3 + $0x3e8] sm:$0xff]  ;;  %v917_v34 = vsel %vm2649_vm15, %v273_v29, 0.0  ;;  %v292_v29 = vld [vmem:[%s2186_s3 + $0x478] sm:$0xff]  ;;  %vm2739_vm2 = vcmp.lt.s32.totalorder %v682_v26, %v2196_v2 }
 0x114   : > { %v310_v26 = vld [vmem:[%s2186_s3 + $0x508] sm:$0xff] }
 0x115   : > { %v1409_v40 = vadd.f32 %v1408_v37, %v898_v35  ;;  %v275_v35 = vld [vmem:[%s2186_s3 + $0x3f0] sm:$0xff] }
 0x117   : > { %v1410_v43 = vadd.f32 %v1409_v40, %v899_v38  ;;  %v918_v38 = vsel %vm2649_vm15, %v274_v32, 0.0  ;;  %v293_v32 = vld [vmem:[%s2186_s3 + $0x480] sm:$0xff] }
 0x119   : > { %v1411_v47 = vadd.f32 %v1410_v43, %v900_v41  ;;  %v919_v41 = vsel %vm2649_vm15, %v275_v35, 0.0  ;;  %v936_v35 = vsel %vm2709_vm1, %v292_v29, 0.0  ;;  %v311_v29 = vld [vmem:[%s2186_s3 + $0x510] sm:$0xff] }
 0x11b   : > { %v1412_v50 = vadd.f32 %v1411_v47, %v901_v44 }
 0x11d   : > { %v1413_v54 = vadd.f32 %v1412_v50, %v902_v48  ;;  %v921_v48 = vsel %vm2679_vm0, %v277_v42, 0.0  ;;  %v296_v42 = vld [vmem:[%s2186_s3 + $0x498] sm:$0xff] }
 0x11f   : > { %v1414_v57 = vadd.f32 %v1413_v54, %v903_v51  ;;  %v922_v51 = vsel %vm2679_vm0, %v278_v46, 0.0  ;;  %v923_v54 = vsel %vm2679_vm0, %v279_v49, 0.0 }
 0x121   : > { %v1415_v60 = vadd.f32 %v1414_v57, %v904_v55  ;;  %v281_v55 = vld [vmem:[%s2186_s3 + $0x420] sm:$0xff]  ;;  %v924_v57 = vsel %vm2679_vm0, %v280_v52, 0.0  ;;  %v683_v52 = vadd.s32 152, %v2194_v1 }
 0x123   : > { %v1416_v63 = vadd.f32 %v1415_v60, %v905_v58  ;;  %v282_v58 = vld [vmem:[%s2186_s3 + $0x428] sm:$0xff]  ;;  %v925_v60 = vsel %vm2679_vm0, %v281_v55, 0.0  ;;  %v300_v55 = vld [vmem:[%s2186_s3 + $0x4b8] sm:$0xff]  ;;  %vm2769_vm3 = vcmp.lt.s32.totalorder %v683_v52, %v2196_v2 }
 0x124   : > { %v318_v52 = vld [vmem:[%s2186_s3 + $0x548] sm:$0xff] }
 0x125   : > { %v1417_v4 = vadd.f32 %v1416_v63, %v906_v61  ;;  %v283_v61 = vld [vmem:[%s2186_s3 + $0x430] sm:$0xff] }
 0x127   : > { %v1418_v7 = vadd.f32 %v1417_v4, %v907_v0  ;;  %v926_v0 = vsel %vm2679_vm0, %v282_v58, 0.0  ;;  %v301_v58 = vld [vmem:[%s2186_s3 + $0x4c0] sm:$0xff] }
 0x129   : > { %v1419_v11 = vadd.f32 %v1418_v7, %v908_v5  ;;  %v927_v5 = vsel %vm2679_vm0, %v283_v61, 0.0  ;;  %v944_v61 = vsel %vm2739_vm2, %v300_v55, 0.0  ;;  %v319_v55 = vld [vmem:[%s2186_s3 + $0x550] sm:$0xff] }
 0x12b   : > { %v1420_v14 = vadd.f32 %v1419_v11, %v909_v8 }
 0x12d   : > { %v1421_v18 = vadd.f32 %v1420_v14, %v910_v12  ;;  %v929_v12 = vsel %vm2709_vm1, %v285_v6, 0.0  ;;  %v304_v6 = vld [vmem:[%s2186_s3 + $0x4d8] sm:$0xff] }
 0x12f   : > { %v1422_v21 = vadd.f32 %v1421_v18, %v911_v15  ;;  %v930_v15 = vsel %vm2709_vm1, %v286_v10, 0.0  ;;  %v931_v18 = vsel %vm2709_vm1, %v287_v13, 0.0 }
 0x131   : > { %v1423_v24 = vadd.f32 %v1422_v21, %v912_v19  ;;  %v289_v19 = vld [vmem:[%s2186_s3 + $0x460] sm:$0xff]  ;;  %v932_v21 = vsel %vm2709_vm1, %v288_v16, 0.0  ;;  %v684_v16 = vadd.s32 160, %v2194_v1 }
 0x133   : > { %v1424_v27 = vadd.f32 %v1423_v24, %v913_v22  ;;  %v290_v22 = vld [vmem:[%s2186_s3 + $0x468] sm:$0xff]  ;;  %v933_v24 = vsel %vm2709_vm1, %v289_v19, 0.0  ;;  %v308_v19 = vld [vmem:[%s2186_s3 + $0x4f8] sm:$0xff]  ;;  %vm2799_vm4 = vcmp.lt.s32.totalorder %v684_v16, %v2196_v2 }
 0x134   : > { %v326_v16 = vld [vmem:[%s2186_s3 + $0x588] sm:$0xff] }
 0x135   : > { %v1425_v30 = vadd.f32 %v1424_v27, %v914_v25  ;;  %v291_v25 = vld [vmem:[%s2186_s3 + $0x470] sm:$0xff] }
 0x137   : > { %v1426_v33 = vadd.f32 %v1425_v30, %v915_v28  ;;  %v934_v28 = vsel %vm2709_vm1, %v290_v22, 0.0  ;;  %v309_v22 = vld [vmem:[%s2186_s3 + $0x500] sm:$0xff] }
 0x139   : > { %v1427_v37 = vadd.f32 %v1426_v33, %v916_v31  ;;  %v935_v31 = vsel %vm2709_vm1, %v291_v25, 0.0  ;;  %v952_v25 = vsel %vm2769_vm3, %v308_v19, 0.0  ;;  %v327_v19 = vld [vmem:[%s2186_s3 + $0x590] sm:$0xff] }
 0x13b   : > { %v1428_v40 = vadd.f32 %v1427_v37, %v917_v34 }
 0x13d   : > { %v1429_v44 = vadd.f32 %v1428_v40, %v918_v38  ;;  %v937_v38 = vsel %vm2739_vm2, %v293_v32, 0.0  ;;  %v312_v32 = vld [vmem:[%s2186_s3 + $0x518] sm:$0xff] }
 0x13f   : > { %v1430_v47 = vadd.f32 %v1429_v44, %v919_v41  ;;  %v938_v41 = vsel %vm2739_vm2, %v294_v36, 0.0  ;;  %v939_v44 = vsel %vm2739_vm2, %v295_v39, 0.0 }
 0x141   : > { %v1431_v50 = vadd.f32 %v1430_v47, %v920_v45  ;;  %v297_v45 = vld [vmem:[%s2186_s3 + $0x4a0] sm:$0xff]  ;;  %v940_v47 = vsel %vm2739_vm2, %v296_v42, 0.0  ;;  %v685_v42 = vadd.s32 168, %v2194_v1 }
 0x143   : > { %v1432_v53 = vadd.f32 %v1431_v50, %v921_v48  ;;  %v298_v48 = vld [vmem:[%s2186_s3 + $0x4a8] sm:$0xff]  ;;  %v941_v50 = vsel %vm2739_vm2, %v297_v45, 0.0  ;;  %v316_v45 = vld [vmem:[%s2186_s3 + $0x538] sm:$0xff]  ;;  %vm2829_vm5 = vcmp.lt.s32.totalorder %v685_v42, %v2196_v2 }
 0x144   : > { %v334_v42 = vld [vmem:[%s2186_s3 + $0x5c8] sm:$0xff] }
 0x145   : > { %v1433_v56 = vadd.f32 %v1432_v53, %v922_v51  ;;  %v299_v51 = vld [vmem:[%s2186_s3 + $0x4b0] sm:$0xff] }
 0x147   : > { %v1434_v59 = vadd.f32 %v1433_v56, %v923_v54  ;;  %v942_v54 = vsel %vm2739_vm2, %v298_v48, 0.0  ;;  %v317_v48 = vld [vmem:[%s2186_s3 + $0x540] sm:$0xff] }
 0x149   : > { %v1435_v63 = vadd.f32 %v1434_v59, %v924_v57  ;;  %v943_v57 = vsel %vm2739_vm2, %v299_v51, 0.0  ;;  %v960_v51 = vsel %vm2799_vm4, %v316_v45, 0.0  ;;  %v335_v45 = vld [vmem:[%s2186_s3 + $0x5d0] sm:$0xff] }
 0x14b   : > { %v1436_v4 = vadd.f32 %v1435_v63, %v925_v60 }
 0x14d   : > { %v1437_v8 = vadd.f32 %v1436_v4, %v926_v0  ;;  %v945_v0 = vsel %vm2769_vm3, %v301_v58, 0.0  ;;  %v320_v58 = vld [vmem:[%s2186_s3 + $0x558] sm:$0xff] }
 0x14f   : > { %v1438_v11 = vadd.f32 %v1437_v8, %v927_v5  ;;  %v946_v5 = vsel %vm2769_vm3, %v302_v62, 0.0  ;;  %v947_v8 = vsel %vm2769_vm3, %v303_v3, 0.0 }
 0x151   : > { %v1439_v14 = vadd.f32 %v1438_v11, %v928_v9  ;;  %v305_v9 = vld [vmem:[%s2186_s3 + $0x4e0] sm:$0xff]  ;;  %v948_v11 = vsel %vm2769_vm3, %v304_v6, 0.0  ;;  %v686_v6 = vadd.s32 176, %v2194_v1 }
 0x153   : > { %v1440_v17 = vadd.f32 %v1439_v14, %v929_v12  ;;  %v306_v12 = vld [vmem:[%s2186_s3 + $0x4e8] sm:$0xff]  ;;  %v949_v14 = vsel %vm2769_vm3, %v305_v9, 0.0  ;;  %v324_v9 = vld [vmem:[%s2186_s3 + $0x578] sm:$0xff]  ;;  %vm2859_vm6 = vcmp.lt.s32.totalorder %v686_v6, %v2196_v2 }
 0x154   : > { %v342_v6 = vld [vmem:[%s2186_s3 + $0x608] sm:$0xff] }
 0x155   : > { %v1441_v20 = vadd.f32 %v1440_v17, %v930_v15  ;;  %v307_v15 = vld [vmem:[%s2186_s3 + $0x4f0] sm:$0xff] }
 0x157   : > { %v1442_v23 = vadd.f32 %v1441_v20, %v931_v18  ;;  %v950_v18 = vsel %vm2769_vm3, %v306_v12, 0.0  ;;  %v325_v12 = vld [vmem:[%s2186_s3 + $0x580] sm:$0xff] }
 0x159   : > { %v1443_v27 = vadd.f32 %v1442_v23, %v932_v21  ;;  %v951_v21 = vsel %vm2769_vm3, %v307_v15, 0.0  ;;  %v968_v15 = vsel %vm2829_vm5, %v324_v9, 0.0  ;;  %v343_v9 = vld [vmem:[%s2186_s3 + $0x610] sm:$0xff] }
 0x15b   : > { %v1444_v30 = vadd.f32 %v1443_v27, %v933_v24 }
 0x15d   : > { %v1445_v34 = vadd.f32 %v1444_v30, %v934_v28  ;;  %v953_v28 = vsel %vm2799_vm4, %v309_v22, 0.0  ;;  %v328_v22 = vld [vmem:[%s2186_s3 + $0x598] sm:$0xff] }
 0x15f   : > { %v1446_v37 = vadd.f32 %v1445_v34, %v935_v31  ;;  %v954_v31 = vsel %vm2799_vm4, %v310_v26, 0.0  ;;  %v955_v34 = vsel %vm2799_vm4, %v311_v29, 0.0 }
 0x161   : > { %v1447_v40 = vadd.f32 %v1446_v37, %v936_v35  ;;  %v313_v35 = vld [vmem:[%s2186_s3 + $0x520] sm:$0xff]  ;;  %v956_v37 = vsel %vm2799_vm4, %v312_v32, 0.0  ;;  %v687_v32 = vadd.s32 184, %v2194_v1 }
 0x163   : > { %v1448_v43 = vadd.f32 %v1447_v40, %v937_v38  ;;  %v314_v38 = vld [vmem:[%s2186_s3 + $0x528] sm:$0xff]  ;;  %v957_v40 = vsel %vm2799_vm4, %v313_v35, 0.0  ;;  %v332_v35 = vld [vmem:[%s2186_s3 + $0x5b8] sm:$0xff]  ;;  %vm2889_vm7 = vcmp.lt.s32.totalorder %v687_v32, %v2196_v2 }
 0x164   : > { %v350_v32 = vld [vmem:[%s2186_s3 + $0x648] sm:$0xff] }
 0x165   : > { %v1449_v46 = vadd.f32 %v1448_v43, %v938_v41  ;;  %v315_v41 = vld [vmem:[%s2186_s3 + $0x530] sm:$0xff] }
 0x167   : > { %v1450_v49 = vadd.f32 %v1449_v46, %v939_v44  ;;  %v958_v44 = vsel %vm2799_vm4, %v314_v38, 0.0  ;;  %v333_v38 = vld [vmem:[%s2186_s3 + $0x5c0] sm:$0xff] }
 0x169   : > { %v1451_v53 = vadd.f32 %v1450_v49, %v940_v47  ;;  %v959_v47 = vsel %vm2799_vm4, %v315_v41, 0.0  ;;  %v976_v41 = vsel %vm2859_vm6, %v332_v35, 0.0  ;;  %v351_v35 = vld [vmem:[%s2186_s3 + $0x650] sm:$0xff] }
 0x16b   : > { %v1452_v56 = vadd.f32 %v1451_v53, %v941_v50 }
 0x16d   : > { %v1453_v60 = vadd.f32 %v1452_v56, %v942_v54  ;;  %v961_v54 = vsel %vm2829_vm5, %v317_v48, 0.0  ;;  %v336_v48 = vld [vmem:[%s2186_s3 + $0x5d8] sm:$0xff] }
 0x16f   : > { %v1454_v63 = vadd.f32 %v1453_v60, %v943_v57  ;;  %v962_v57 = vsel %vm2829_vm5, %v318_v52, 0.0  ;;  %v963_v60 = vsel %vm2829_vm5, %v319_v55, 0.0 }
 0x171   : > { %v1455_v4 = vadd.f32 %v1454_v63, %v944_v61  ;;  %v321_v61 = vld [vmem:[%s2186_s3 + $0x560] sm:$0xff]  ;;  %v964_v63 = vsel %vm2829_vm5, %v320_v58, 0.0  ;;  %v688_v58 = vadd.s32 192, %v2194_v1 }
 0x173   : > { %v1456_v7 = vadd.f32 %v1455_v4, %v945_v0  ;;  %v322_v0 = vld [vmem:[%s2186_s3 + $0x568] sm:$0xff]  ;;  %v965_v4 = vsel %vm2829_vm5, %v321_v61, 0.0  ;;  %v340_v61 = vld [vmem:[%s2186_s3 + $0x5f8] sm:$0xff]  ;;  %vm2919_vm8 = vcmp.lt.s32.totalorder %v688_v58, %v2196_v2 }
 0x174   : > { %v358_v58 = vld [vmem:[%s2186_s3 + $0x688] sm:$0xff] }
 0x175   : > { %v1457_v10 = vadd.f32 %v1456_v7, %v946_v5  ;;  %v323_v5 = vld [vmem:[%s2186_s3 + $0x570] sm:$0xff] }
 0x177   : > { %v1458_v13 = vadd.f32 %v1457_v10, %v947_v8  ;;  %v966_v8 = vsel %vm2829_vm5, %v322_v0, 0.0  ;;  %v341_v0 = vld [vmem:[%s2186_s3 + $0x600] sm:$0xff] }
 0x179   : > { %v1459_v17 = vadd.f32 %v1458_v13, %v948_v11  ;;  %v967_v11 = vsel %vm2829_vm5, %v323_v5, 0.0  ;;  %v984_v5 = vsel %vm2889_vm7, %v340_v61, 0.0  ;;  %v359_v61 = vld [vmem:[%s2186_s3 + $0x690] sm:$0xff] }
 0x17b   : > { %v1460_v20 = vadd.f32 %v1459_v17, %v949_v14 }
 0x17d   : > { %v1461_v24 = vadd.f32 %v1460_v20, %v950_v18  ;;  %v969_v18 = vsel %vm2859_vm6, %v325_v12, 0.0  ;;  %v344_v12 = vld [vmem:[%s2186_s3 + $0x618] sm:$0xff] }
 0x17f   : > { %v1462_v27 = vadd.f32 %v1461_v24, %v951_v21  ;;  %v970_v21 = vsel %vm2859_vm6, %v326_v16, 0.0  ;;  %v971_v24 = vsel %vm2859_vm6, %v327_v19, 0.0 }
 0x181   : > { %v1463_v30 = vadd.f32 %v1462_v27, %v952_v25  ;;  %v329_v25 = vld [vmem:[%s2186_s3 + $0x5a0] sm:$0xff]  ;;  %v972_v27 = vsel %vm2859_vm6, %v328_v22, 0.0  ;;  %v689_v22 = vadd.s32 200, %v2194_v1 }
 0x183   : > { %v1464_v33 = vadd.f32 %v1463_v30, %v953_v28  ;;  %v330_v28 = vld [vmem:[%s2186_s3 + $0x5a8] sm:$0xff]  ;;  %v973_v30 = vsel %vm2859_vm6, %v329_v25, 0.0  ;;  %v348_v25 = vld [vmem:[%s2186_s3 + $0x638] sm:$0xff]  ;;  %vm2949_vm9 = vcmp.lt.s32.totalorder %v689_v22, %v2196_v2 }
 0x184   : > { %v366_v22 = vld [vmem:[%s2186_s3 + $0x6c8] sm:$0xff] }
 0x185   : > { %v1465_v36 = vadd.f32 %v1464_v33, %v954_v31  ;;  %v331_v31 = vld [vmem:[%s2186_s3 + $0x5b0] sm:$0xff] }
 0x187   : > { %v1466_v39 = vadd.f32 %v1465_v36, %v955_v34  ;;  %v974_v34 = vsel %vm2859_vm6, %v330_v28, 0.0  ;;  %v349_v28 = vld [vmem:[%s2186_s3 + $0x640] sm:$0xff] }
 0x189   : > { %v1467_v43 = vadd.f32 %v1466_v39, %v956_v37  ;;  %v975_v37 = vsel %vm2859_vm6, %v331_v31, 0.0  ;;  %v992_v31 = vsel %vm2919_vm8, %v348_v25, 0.0  ;;  %v367_v25 = vld [vmem:[%s2186_s3 + $0x6d0] sm:$0xff] }
 0x18b   : > { %v1468_v46 = vadd.f32 %v1467_v43, %v957_v40 }
 0x18d   : > { %v1469_v50 = vadd.f32 %v1468_v46, %v958_v44  ;;  %v977_v44 = vsel %vm2889_vm7, %v333_v38, 0.0  ;;  %v352_v38 = vld [vmem:[%s2186_s3 + $0x658] sm:$0xff] }
 0x18f   : > { %v1470_v53 = vadd.f32 %v1469_v50, %v959_v47  ;;  %v978_v47 = vsel %vm2889_vm7, %v334_v42, 0.0  ;;  %v979_v50 = vsel %vm2889_vm7, %v335_v45, 0.0 }
 0x191   : > { %v1471_v56 = vadd.f32 %v1470_v53, %v960_v51  ;;  %v337_v51 = vld [vmem:[%s2186_s3 + $0x5e0] sm:$0xff]  ;;  %v980_v53 = vsel %vm2889_vm7, %v336_v48, 0.0  ;;  %v690_v48 = vadd.s32 208, %v2194_v1 }
 0x193   : > { %v1472_v59 = vadd.f32 %v1471_v56, %v961_v54  ;;  %v338_v54 = vld [vmem:[%s2186_s3 + $0x5e8] sm:$0xff]  ;;  %v981_v56 = vsel %vm2889_vm7, %v337_v51, 0.0  ;;  %v356_v51 = vld [vmem:[%s2186_s3 + $0x678] sm:$0xff]  ;;  %vm2979_vm10 = vcmp.lt.s32.totalorder %v690_v48, %v2196_v2 }
 0x194   : > { %v374_v48 = vld [vmem:[%s2186_s3 + $0x708] sm:$0xff] }
 0x195   : > { %v1473_v62 = vadd.f32 %v1472_v59, %v962_v57  ;;  %v339_v57 = vld [vmem:[%s2186_s3 + $0x5f0] sm:$0xff] }
 0x197   : > { %v1474_v3 = vadd.f32 %v1473_v62, %v963_v60  ;;  %v982_v60 = vsel %vm2889_vm7, %v338_v54, 0.0  ;;  %v357_v54 = vld [vmem:[%s2186_s3 + $0x680] sm:$0xff] }
 0x199   : > { %v1475_v7 = vadd.f32 %v1474_v3, %v964_v63  ;;  %v983_v63 = vsel %vm2889_vm7, %v339_v57, 0.0  ;;  %v1000_v57 = vsel %vm2949_vm9, %v356_v51, 0.0  ;;  %v375_v51 = vld [vmem:[%s2186_s3 + $0x710] sm:$0xff] }
 0x19b   : > { %v1476_v10 = vadd.f32 %v1475_v7, %v965_v4 }
 0x19d   : > { %v1477_v14 = vadd.f32 %v1476_v10, %v966_v8  ;;  %v985_v8 = vsel %vm2919_vm8, %v341_v0, 0.0  ;;  %v360_v0 = vld [vmem:[%s2186_s3 + $0x698] sm:$0xff] }
 0x19f   : > { %v1478_v17 = vadd.f32 %v1477_v14, %v967_v11  ;;  %v986_v11 = vsel %vm2919_vm8, %v342_v6, 0.0  ;;  %v987_v14 = vsel %vm2919_vm8, %v343_v9, 0.0 }
 0x1a1   : > { %v1479_v20 = vadd.f32 %v1478_v17, %v968_v15  ;;  %v345_v15 = vld [vmem:[%s2186_s3 + $0x620] sm:$0xff]  ;;  %v988_v17 = vsel %vm2919_vm8, %v344_v12, 0.0  ;;  %v691_v12 = vadd.s32 216, %v2194_v1 }
 0x1a3   : > { %v1480_v23 = vadd.f32 %v1479_v20, %v969_v18  ;;  %v346_v18 = vld [vmem:[%s2186_s3 + $0x628] sm:$0xff]  ;;  %v989_v20 = vsel %vm2919_vm8, %v345_v15, 0.0  ;;  %v364_v15 = vld [vmem:[%s2186_s3 + $0x6b8] sm:$0xff]  ;;  %vm3009_vm11 = vcmp.lt.s32.totalorder %v691_v12, %v2196_v2 }
 0x1a4   : > { %v382_v12 = vld [vmem:[%s2186_s3 + $0x748] sm:$0xff] }
 0x1a5   : > { %v1481_v26 = vadd.f32 %v1480_v23, %v970_v21  ;;  %v347_v21 = vld [vmem:[%s2186_s3 + $0x630] sm:$0xff] }
 0x1a7   : > { %v1482_v29 = vadd.f32 %v1481_v26, %v971_v24  ;;  %v990_v24 = vsel %vm2919_vm8, %v346_v18, 0.0  ;;  %v365_v18 = vld [vmem:[%s2186_s3 + $0x6c0] sm:$0xff] }
 0x1a9   : > { %v1483_v33 = vadd.f32 %v1482_v29, %v972_v27  ;;  %v991_v27 = vsel %vm2919_vm8, %v347_v21, 0.0  ;;  %v1008_v21 = vsel %vm2979_vm10, %v364_v15, 0.0  ;;  %v383_v15 = vld [vmem:[%s2186_s3 + $0x750] sm:$0xff] }
 0x1ab   : > { %v1484_v36 = vadd.f32 %v1483_v33, %v973_v30 }
 0x1ad   : > { %v1485_v40 = vadd.f32 %v1484_v36, %v974_v34  ;;  %v993_v34 = vsel %vm2949_vm9, %v349_v28, 0.0  ;;  %v368_v28 = vld [vmem:[%s2186_s3 + $0x6d8] sm:$0xff] }
 0x1af   : > { %v1486_v43 = vadd.f32 %v1485_v40, %v975_v37  ;;  %v994_v37 = vsel %vm2949_vm9, %v350_v32, 0.0  ;;  %v995_v40 = vsel %vm2949_vm9, %v351_v35, 0.0 }
 0x1b1   : > { %v1487_v46 = vadd.f32 %v1486_v43, %v976_v41  ;;  %v353_v41 = vld [vmem:[%s2186_s3 + $0x660] sm:$0xff]  ;;  %v996_v43 = vsel %vm2949_vm9, %v352_v38, 0.0  ;;  %v692_v38 = vadd.s32 224, %v2194_v1 }
 0x1b3   : > { %v1488_v49 = vadd.f32 %v1487_v46, %v977_v44  ;;  %v354_v44 = vld [vmem:[%s2186_s3 + $0x668] sm:$0xff]  ;;  %v997_v46 = vsel %vm2949_vm9, %v353_v41, 0.0  ;;  %v372_v41 = vld [vmem:[%s2186_s3 + $0x6f8] sm:$0xff]  ;;  %vm3039_vm12 = vcmp.lt.s32.totalorder %v692_v38, %v2196_v2 }
 0x1b4   : > { %v390_v38 = vld [vmem:[%s2186_s3 + $0x788] sm:$0xff] }
 0x1b5   : > { %v1489_v52 = vadd.f32 %v1488_v49, %v978_v47  ;;  %v355_v47 = vld [vmem:[%s2186_s3 + $0x670] sm:$0xff] }
 0x1b7   : > { %v1490_v55 = vadd.f32 %v1489_v52, %v979_v50  ;;  %v998_v50 = vsel %vm2949_vm9, %v354_v44, 0.0  ;;  %v373_v44 = vld [vmem:[%s2186_s3 + $0x700] sm:$0xff] }
 0x1b9   : > { %v1491_v59 = vadd.f32 %v1490_v55, %v980_v53  ;;  %v999_v53 = vsel %vm2949_vm9, %v355_v47, 0.0  ;;  %v1016_v47 = vsel %vm3009_vm11, %v372_v41, 0.0  ;;  %v391_v41 = vld [vmem:[%s2186_s3 + $0x790] sm:$0xff] }
 0x1bb   : > { %v1492_v62 = vadd.f32 %v1491_v59, %v981_v56 }
 0x1bd   : > { %v1493_v4 = vadd.f32 %v1492_v62, %v982_v60  ;;  %v1001_v60 = vsel %vm2979_vm10, %v357_v54, 0.0  ;;  %v376_v54 = vld [vmem:[%s2186_s3 + $0x718] sm:$0xff] }
 0x1bf   : > { %v1494_v7 = vadd.f32 %v1493_v4, %v983_v63  ;;  %v1002_v63 = vsel %vm2979_vm10, %v358_v58, 0.0  ;;  %v1003_v4 = vsel %vm2979_vm10, %v359_v61, 0.0 }
 0x1c1   : > { %v1495_v10 = vadd.f32 %v1494_v7, %v984_v5  ;;  %v361_v5 = vld [vmem:[%s2186_s3 + $0x6a0] sm:$0xff]  ;;  %v1004_v7 = vsel %vm2979_vm10, %v360_v0, 0.0  ;;  %v693_v0 = vadd.s32 232, %v2194_v1 }
 0x1c3   : > { %v1496_v13 = vadd.f32 %v1495_v10, %v985_v8  ;;  %v362_v8 = vld [vmem:[%s2186_s3 + $0x6a8] sm:$0xff]  ;;  %v1005_v10 = vsel %vm2979_vm10, %v361_v5, 0.0  ;;  %v380_v5 = vld [vmem:[%s2186_s3 + $0x738] sm:$0xff]  ;;  %vm3069_vm13 = vcmp.lt.s32.totalorder %v693_v0, %v2196_v2 }
 0x1c4   : > { %v398_v0 = vld [vmem:[%s2186_s3 + $0x7c8] sm:$0xff] }
 0x1c5   : > { %v1497_v16 = vadd.f32 %v1496_v13, %v986_v11  ;;  %v363_v11 = vld [vmem:[%s2186_s3 + $0x6b0] sm:$0xff] }
 0x1c7   : > { %v1498_v19 = vadd.f32 %v1497_v16, %v987_v14  ;;  %v1006_v14 = vsel %vm2979_vm10, %v362_v8, 0.0  ;;  %v381_v8 = vld [vmem:[%s2186_s3 + $0x740] sm:$0xff] }
 0x1c9   : > { %v1499_v23 = vadd.f32 %v1498_v19, %v988_v17  ;;  %v1007_v17 = vsel %vm2979_vm10, %v363_v11, 0.0  ;;  %v1024_v11 = vsel %vm3039_vm12, %v380_v5, 0.0  ;;  %v399_v5 = vld [vmem:[%s2186_s3 + $0x7d0] sm:$0xff] }
 0x1cb   : > { %v1500_v26 = vadd.f32 %v1499_v23, %v989_v20 }
 0x1cd   : > { %v1501_v30 = vadd.f32 %v1500_v26, %v990_v24  ;;  %v1009_v24 = vsel %vm3009_vm11, %v365_v18, 0.0  ;;  %v384_v18 = vld [vmem:[%s2186_s3 + $0x758] sm:$0xff] }
 0x1cf   : > { %v1502_v33 = vadd.f32 %v1501_v30, %v991_v27  ;;  %v1010_v27 = vsel %vm3009_vm11, %v366_v22, 0.0  ;;  %v1011_v30 = vsel %vm3009_vm11, %v367_v25, 0.0 }
 0x1d1   : > { %v1503_v36 = vadd.f32 %v1502_v33, %v992_v31  ;;  %v369_v31 = vld [vmem:[%s2186_s3 + $0x6e0] sm:$0xff]  ;;  %v1012_v33 = vsel %vm3009_vm11, %v368_v28, 0.0  ;;  %v694_v28 = vadd.s32 240, %v2194_v1 }
 0x1d3   : > { %v1504_v39 = vadd.f32 %v1503_v36, %v993_v34  ;;  %v370_v34 = vld [vmem:[%s2186_s3 + $0x6e8] sm:$0xff]  ;;  %v1013_v36 = vsel %vm3009_vm11, %v369_v31, 0.0  ;;  %v388_v31 = vld [vmem:[%s2186_s3 + $0x778] sm:$0xff]  ;;  %vm3099_vm14 = vcmp.lt.s32.totalorder %v694_v28, %v2196_v2 }
 0x1d4   : > { %v406_v28 = vld [vmem:[%s2186_s3 + $0x808] sm:$0xff] }
 0x1d5   : > { %v1505_v42 = vadd.f32 %v1504_v39, %v994_v37  ;;  %v371_v37 = vld [vmem:[%s2186_s3 + $0x6f0] sm:$0xff] }
 0x1d7   : > { %v1506_v45 = vadd.f32 %v1505_v42, %v995_v40  ;;  %v1014_v40 = vsel %vm3009_vm11, %v370_v34, 0.0  ;;  %v389_v34 = vld [vmem:[%s2186_s3 + $0x780] sm:$0xff] }
 0x1d9   : > { %v1507_v49 = vadd.f32 %v1506_v45, %v996_v43  ;;  %v1015_v43 = vsel %vm3009_vm11, %v371_v37, 0.0  ;;  %v1032_v37 = vsel %vm3069_vm13, %v388_v31, 0.0  ;;  %v407_v31 = vld [vmem:[%s2186_s3 + $0x810] sm:$0xff] }
 0x1db   : > { %v1508_v52 = vadd.f32 %v1507_v49, %v997_v46 }
 0x1dd   : > { %v1509_v56 = vadd.f32 %v1508_v52, %v998_v50  ;;  %v1017_v50 = vsel %vm3039_vm12, %v373_v44, 0.0  ;;  %v392_v44 = vld [vmem:[%s2186_s3 + $0x798] sm:$0xff] }
 0x1df   : > { %v1510_v59 = vadd.f32 %v1509_v56, %v999_v53  ;;  %v1018_v53 = vsel %vm3039_vm12, %v374_v48, 0.0  ;;  %v1019_v56 = vsel %vm3039_vm12, %v375_v51, 0.0 }
 0x1e1   : > { %v1511_v62 = vadd.f32 %v1510_v59, %v1000_v57  ;;  %v377_v57 = vld [vmem:[%s2186_s3 + $0x720] sm:$0xff]  ;;  %v1020_v59 = vsel %vm3039_vm12, %v376_v54, 0.0  ;;  %v695_v54 = vadd.s32 248, %v2194_v1 }
 0x1e3   : > { %v1512_v3 = vadd.f32 %v1511_v62, %v1001_v60  ;;  %v378_v60 = vld [vmem:[%s2186_s3 + $0x728] sm:$0xff]  ;;  %v1021_v62 = vsel %vm3039_vm12, %v377_v57, 0.0  ;;  %v396_v57 = vld [vmem:[%s2186_s3 + $0x7b8] sm:$0xff]  ;;  %vm3129_vm15 = vcmp.lt.s32.totalorder %v695_v54, %v2196_v2 }
 0x1e4   : > { %v414_v54 = vld [vmem:[%s2186_s3 + $0x848] sm:$0xff] }
 0x1e5   : > { %v1513_v6 = vadd.f32 %v1512_v3, %v1002_v63  ;;  %v379_v63 = vld [vmem:[%s2186_s3 + $0x730] sm:$0xff] }
 0x1e7   : > { %v1514_v9 = vadd.f32 %v1513_v6, %v1003_v4  ;;  %v1022_v4 = vsel %vm3039_vm12, %v378_v60, 0.0  ;;  %v397_v60 = vld [vmem:[%s2186_s3 + $0x7c0] sm:$0xff] }
 0x1e9   : > { %v1515_v13 = vadd.f32 %v1514_v9, %v1004_v7  ;;  %v1023_v7 = vsel %vm3039_vm12, %v379_v63, 0.0  ;;  %v1040_v63 = vsel %vm3099_vm14, %v396_v57, 0.0  ;;  %v415_v57 = vld [vmem:[%s2186_s3 + $0x850] sm:$0xff] }
 0x1eb   : > { %v1516_v16 = vadd.f32 %v1515_v13, %v1005_v10 }
 0x1ed   : > { %v1517_v20 = vadd.f32 %v1516_v16, %v1006_v14  ;;  %v1025_v14 = vsel %vm3069_vm13, %v381_v8, 0.0  ;;  %v400_v8 = vld [vmem:[%s2186_s3 + $0x7d8] sm:$0xff] }
 0x1ef   : > { %v1518_v23 = vadd.f32 %v1517_v20, %v1007_v17  ;;  %v1026_v17 = vsel %vm3069_vm13, %v382_v12, 0.0  ;;  %v1027_v20 = vsel %vm3069_vm13, %v383_v15, 0.0 }
 0x1f1   : > { %v1519_v26 = vadd.f32 %v1518_v23, %v1008_v21  ;;  %v385_v21 = vld [vmem:[%s2186_s3 + $0x760] sm:$0xff]  ;;  %v1028_v23 = vsel %vm3069_vm13, %v384_v18, 0.0  ;;  %v696_v18 = vadd.s32 256, %v2194_v1 }
 0x1f3   : > { %v1520_v29 = vadd.f32 %v1519_v26, %v1009_v24  ;;  %v386_v24 = vld [vmem:[%s2186_s3 + $0x768] sm:$0xff]  ;;  %v1029_v26 = vsel %vm3069_vm13, %v385_v21, 0.0  ;;  %v404_v21 = vld [vmem:[%s2186_s3 + $0x7f8] sm:$0xff]  ;;  %vm3159_vm0 = vcmp.lt.s32.totalorder %v696_v18, %v2196_v2 }
 0x1f4   : > { %v422_v18 = vld [vmem:[%s2186_s3 + $0x888] sm:$0xff] }
 0x1f5   : > { %v1521_v32 = vadd.f32 %v1520_v29, %v1010_v27  ;;  %v387_v27 = vld [vmem:[%s2186_s3 + $0x770] sm:$0xff] }
 0x1f7   : > { %v1522_v35 = vadd.f32 %v1521_v32, %v1011_v30  ;;  %v1030_v30 = vsel %vm3069_vm13, %v386_v24, 0.0  ;;  %v405_v24 = vld [vmem:[%s2186_s3 + $0x800] sm:$0xff] }
 0x1f9   : > { %v1523_v39 = vadd.f32 %v1522_v35, %v1012_v33  ;;  %v1031_v33 = vsel %vm3069_vm13, %v387_v27, 0.0  ;;  %v1048_v27 = vsel %vm3129_vm15, %v404_v21, 0.0  ;;  %v423_v21 = vld [vmem:[%s2186_s3 + $0x890] sm:$0xff] }
 0x1fb   : > { %v1524_v42 = vadd.f32 %v1523_v39, %v1013_v36 }
 0x1fd   : > { %v1525_v46 = vadd.f32 %v1524_v42, %v1014_v40  ;;  %v1033_v40 = vsel %vm3099_vm14, %v389_v34, 0.0  ;;  %v408_v34 = vld [vmem:[%s2186_s3 + $0x818] sm:$0xff] }
 0x1ff   : > { %v1526_v49 = vadd.f32 %v1525_v46, %v1015_v43  ;;  %v1034_v43 = vsel %vm3099_vm14, %v390_v38, 0.0  ;;  %v1035_v46 = vsel %vm3099_vm14, %v391_v41, 0.0 }
 0x201   : > { %v1527_v52 = vadd.f32 %v1526_v49, %v1016_v47  ;;  %v393_v47 = vld [vmem:[%s2186_s3 + $0x7a0] sm:$0xff]  ;;  %v1036_v49 = vsel %vm3099_vm14, %v392_v44, 0.0  ;;  %v697_v44 = vadd.s32 264, %v2194_v1 }
 0x203   : > { %v1528_v55 = vadd.f32 %v1527_v52, %v1017_v50  ;;  %v394_v50 = vld [vmem:[%s2186_s3 + $0x7a8] sm:$0xff]  ;;  %v1037_v52 = vsel %vm3099_vm14, %v393_v47, 0.0  ;;  %v412_v47 = vld [vmem:[%s2186_s3 + $0x838] sm:$0xff]  ;;  %vm3189_vm1 = vcmp.lt.s32.totalorder %v697_v44, %v2196_v2 }
 0x204   : > { %v430_v44 = vld [vmem:[%s2186_s3 + $0x8c8] sm:$0xff] }
 0x205   : > { %v1529_v58 = vadd.f32 %v1528_v55, %v1018_v53  ;;  %v395_v53 = vld [vmem:[%s2186_s3 + $0x7b0] sm:$0xff] }
 0x207   : > { %v1530_v61 = vadd.f32 %v1529_v58, %v1019_v56  ;;  %v1038_v56 = vsel %vm3099_vm14, %v394_v50, 0.0  ;;  %v413_v50 = vld [vmem:[%s2186_s3 + $0x840] sm:$0xff] }
 0x209   : > { %v1531_v3 = vadd.f32 %v1530_v61, %v1020_v59  ;;  %v1039_v59 = vsel %vm3099_vm14, %v395_v53, 0.0  ;;  %v1056_v53 = vsel %vm3159_vm0, %v412_v47, 0.0  ;;  %v431_v47 = vld [vmem:[%s2186_s3 + $0x8d0] sm:$0xff] }
 0x20b   : > { %v1532_v6 = vadd.f32 %v1531_v3, %v1021_v62 }
 0x20d   : > { %v1533_v10 = vadd.f32 %v1532_v6, %v1022_v4  ;;  %v1041_v4 = vsel %vm3129_vm15, %v397_v60, 0.0  ;;  %v416_v60 = vld [vmem:[%s2186_s3 + $0x858] sm:$0xff] }
 0x20f   : > { %v1534_v13 = vadd.f32 %v1533_v10, %v1023_v7  ;;  %v1042_v7 = vsel %vm3129_vm15, %v398_v0, 0.0  ;;  %v1043_v10 = vsel %vm3129_vm15, %v399_v5, 0.0 }
 0x211   : > { %v1535_v16 = vadd.f32 %v1534_v13, %v1024_v11  ;;  %v401_v11 = vld [vmem:[%s2186_s3 + $0x7e0] sm:$0xff]  ;;  %v1044_v13 = vsel %vm3129_vm15, %v400_v8, 0.0  ;;  %v698_v8 = vadd.s32 272, %v2194_v1 }
 0x213   : > { %v1536_v19 = vadd.f32 %v1535_v16, %v1025_v14  ;;  %v402_v14 = vld [vmem:[%s2186_s3 + $0x7e8] sm:$0xff]  ;;  %v1045_v16 = vsel %vm3129_vm15, %v401_v11, 0.0  ;;  %v420_v11 = vld [vmem:[%s2186_s3 + $0x878] sm:$0xff]  ;;  %vm3219_vm2 = vcmp.lt.s32.totalorder %v698_v8, %v2196_v2 }
 0x214   : > { %v438_v8 = vld [vmem:[%s2186_s3 + $0x908] sm:$0xff] }
 0x215   : > { %v1537_v22 = vadd.f32 %v1536_v19, %v1026_v17  ;;  %v403_v17 = vld [vmem:[%s2186_s3 + $0x7f0] sm:$0xff] }
 0x217   : > { %v1538_v25 = vadd.f32 %v1537_v22, %v1027_v20  ;;  %v1046_v20 = vsel %vm3129_vm15, %v402_v14, 0.0  ;;  %v421_v14 = vld [vmem:[%s2186_s3 + $0x880] sm:$0xff] }
 0x219   : > { %v1539_v29 = vadd.f32 %v1538_v25, %v1028_v23  ;;  %v1047_v23 = vsel %vm3129_vm15, %v403_v17, 0.0  ;;  %v1064_v17 = vsel %vm3189_vm1, %v420_v11, 0.0  ;;  %v439_v11 = vld [vmem:[%s2186_s3 + $0x910] sm:$0xff] }
 0x21b   : > { %v1540_v32 = vadd.f32 %v1539_v29, %v1029_v26 }
 0x21d   : > { %v1541_v36 = vadd.f32 %v1540_v32, %v1030_v30  ;;  %v1049_v30 = vsel %vm3159_vm0, %v405_v24, 0.0  ;;  %v424_v24 = vld [vmem:[%s2186_s3 + $0x898] sm:$0xff] }
 0x21f   : > { %v1542_v39 = vadd.f32 %v1541_v36, %v1031_v33  ;;  %v1050_v33 = vsel %vm3159_vm0, %v406_v28, 0.0  ;;  %v1051_v36 = vsel %vm3159_vm0, %v407_v31, 0.0 }
 0x221   : > { %v1543_v42 = vadd.f32 %v1542_v39, %v1032_v37  ;;  %v409_v37 = vld [vmem:[%s2186_s3 + $0x820] sm:$0xff]  ;;  %v1052_v39 = vsel %vm3159_vm0, %v408_v34, 0.0  ;;  %v699_v34 = vadd.s32 280, %v2194_v1 }
 0x223   : > { %v1544_v45 = vadd.f32 %v1543_v42, %v1033_v40  ;;  %v410_v40 = vld [vmem:[%s2186_s3 + $0x828] sm:$0xff]  ;;  %v1053_v42 = vsel %vm3159_vm0, %v409_v37, 0.0  ;;  %v428_v37 = vld [vmem:[%s2186_s3 + $0x8b8] sm:$0xff]  ;;  %vm3249_vm3 = vcmp.lt.s32.totalorder %v699_v34, %v2196_v2 }
 0x224   : > { %v446_v34 = vld [vmem:[%s2186_s3 + $0x948] sm:$0xff] }
 0x225   : > { %v1545_v48 = vadd.f32 %v1544_v45, %v1034_v43  ;;  %v411_v43 = vld [vmem:[%s2186_s3 + $0x830] sm:$0xff] }
 0x227   : > { %v1546_v51 = vadd.f32 %v1545_v48, %v1035_v46  ;;  %v1054_v46 = vsel %vm3159_vm0, %v410_v40, 0.0  ;;  %v429_v40 = vld [vmem:[%s2186_s3 + $0x8c0] sm:$0xff] }
 0x229   : > { %v1547_v55 = vadd.f32 %v1546_v51, %v1036_v49  ;;  %v1055_v49 = vsel %vm3159_vm0, %v411_v43, 0.0  ;;  %v1072_v43 = vsel %vm3219_vm2, %v428_v37, 0.0  ;;  %v447_v37 = vld [vmem:[%s2186_s3 + $0x950] sm:$0xff] }
 0x22b   : > { %v1548_v58 = vadd.f32 %v1547_v55, %v1037_v52 }
 0x22d   : > { %v1549_v62 = vadd.f32 %v1548_v58, %v1038_v56  ;;  %v1057_v56 = vsel %vm3189_vm1, %v413_v50, 0.0  ;;  %v432_v50 = vld [vmem:[%s2186_s3 + $0x8d8] sm:$0xff] }
 0x22f   : > { %v1550_v3 = vadd.f32 %v1549_v62, %v1039_v59  ;;  %v1058_v59 = vsel %vm3189_vm1, %v414_v54, 0.0  ;;  %v1059_v62 = vsel %vm3189_vm1, %v415_v57, 0.0 }
 0x231   : > { %v1551_v6 = vadd.f32 %v1550_v3, %v1040_v63  ;;  %v417_v63 = vld [vmem:[%s2186_s3 + $0x860] sm:$0xff]  ;;  %v1060_v3 = vsel %vm3189_vm1, %v416_v60, 0.0  ;;  %v700_v60 = vadd.s32 288, %v2194_v1 }
 0x233   : > { %v1552_v9 = vadd.f32 %v1551_v6, %v1041_v4  ;;  %v418_v4 = vld [vmem:[%s2186_s3 + $0x868] sm:$0xff]  ;;  %v1061_v6 = vsel %vm3189_vm1, %v417_v63, 0.0  ;;  %v436_v63 = vld [vmem:[%s2186_s3 + $0x8f8] sm:$0xff]  ;;  %vm3279_vm4 = vcmp.lt.s32.totalorder %v700_v60, %v2196_v2 }
 0x234   : > { %v454_v60 = vld [vmem:[%s2186_s3 + $0x988] sm:$0xff] }
 0x235   : > { %v1553_v12 = vadd.f32 %v1552_v9, %v1042_v7  ;;  %v419_v7 = vld [vmem:[%s2186_s3 + $0x870] sm:$0xff] }
 0x237   : > { %v1554_v15 = vadd.f32 %v1553_v12, %v1043_v10  ;;  %v1062_v10 = vsel %vm3189_vm1, %v418_v4, 0.0  ;;  %v437_v4 = vld [vmem:[%s2186_s3 + $0x900] sm:$0xff] }
 0x239   : > { %v1555_v19 = vadd.f32 %v1554_v15, %v1044_v13  ;;  %v1063_v13 = vsel %vm3189_vm1, %v419_v7, 0.0  ;;  %v1080_v7 = vsel %vm3249_vm3, %v436_v63, 0.0  ;;  %v455_v63 = vld [vmem:[%s2186_s3 + $0x990] sm:$0xff] }
 0x23b   : > { %v1556_v22 = vadd.f32 %v1555_v19, %v1045_v16 }
 0x23d   : > { %v1557_v26 = vadd.f32 %v1556_v22, %v1046_v20  ;;  %v1065_v20 = vsel %vm3219_vm2, %v421_v14, 0.0  ;;  %v440_v14 = vld [vmem:[%s2186_s3 + $0x918] sm:$0xff] }
 0x23f   : > { %v1558_v29 = vadd.f32 %v1557_v26, %v1047_v23  ;;  %v1066_v23 = vsel %vm3219_vm2, %v422_v18, 0.0  ;;  %v1067_v26 = vsel %vm3219_vm2, %v423_v21, 0.0 }
 0x241   : > { %v1559_v32 = vadd.f32 %v1558_v29, %v1048_v27  ;;  %v425_v27 = vld [vmem:[%s2186_s3 + $0x8a0] sm:$0xff]  ;;  %v1068_v29 = vsel %vm3219_vm2, %v424_v24, 0.0  ;;  %v701_v24 = vadd.s32 296, %v2194_v1 }
 0x243   : > { %v1560_v35 = vadd.f32 %v1559_v32, %v1049_v30  ;;  %v426_v30 = vld [vmem:[%s2186_s3 + $0x8a8] sm:$0xff]  ;;  %v1069_v32 = vsel %vm3219_vm2, %v425_v27, 0.0  ;;  %v444_v27 = vld [vmem:[%s2186_s3 + $0x938] sm:$0xff]  ;;  %vm3309_vm5 = vcmp.lt.s32.totalorder %v701_v24, %v2196_v2 }
 0x244   : > { %v462_v24 = vld [vmem:[%s2186_s3 + $0x9c8] sm:$0xff] }
 0x245   : > { %v1561_v38 = vadd.f32 %v1560_v35, %v1050_v33  ;;  %v427_v33 = vld [vmem:[%s2186_s3 + $0x8b0] sm:$0xff] }
 0x247   : > { %v1562_v41 = vadd.f32 %v1561_v38, %v1051_v36  ;;  %v1070_v36 = vsel %vm3219_vm2, %v426_v30, 0.0  ;;  %v445_v30 = vld [vmem:[%s2186_s3 + $0x940] sm:$0xff] }
 0x249   : > { %v1563_v45 = vadd.f32 %v1562_v41, %v1052_v39  ;;  %v1071_v39 = vsel %vm3219_vm2, %v427_v33, 0.0  ;;  %v1088_v33 = vsel %vm3279_vm4, %v444_v27, 0.0  ;;  %v463_v27 = vld [vmem:[%s2186_s3 + $0x9d0] sm:$0xff] }
 0x24b   : > { %v1564_v48 = vadd.f32 %v1563_v45, %v1053_v42 }
 0x24d   : > { %v1565_v52 = vadd.f32 %v1564_v48, %v1054_v46  ;;  %v1073_v46 = vsel %vm3249_vm3, %v429_v40, 0.0  ;;  %v448_v40 = vld [vmem:[%s2186_s3 + $0x958] sm:$0xff] }
 0x24f   : > { %v1566_v55 = vadd.f32 %v1565_v52, %v1055_v49  ;;  %v1074_v49 = vsel %vm3249_vm3, %v430_v44, 0.0  ;;  %v1075_v52 = vsel %vm3249_vm3, %v431_v47, 0.0 }
 0x251   : > { %v1567_v58 = vadd.f32 %v1566_v55, %v1056_v53  ;;  %v433_v53 = vld [vmem:[%s2186_s3 + $0x8e0] sm:$0xff]  ;;  %v1076_v55 = vsel %vm3249_vm3, %v432_v50, 0.0  ;;  %v702_v50 = vadd.s32 304, %v2194_v1 }
 0x253   : > { %v1568_v61 = vadd.f32 %v1567_v58, %v1057_v56  ;;  %v434_v56 = vld [vmem:[%s2186_s3 + $0x8e8] sm:$0xff]  ;;  %v1077_v58 = vsel %vm3249_vm3, %v433_v53, 0.0  ;;  %v452_v53 = vld [vmem:[%s2186_s3 + $0x978] sm:$0xff]  ;;  %vm3339_vm6 = vcmp.lt.s32.totalorder %v702_v50, %v2196_v2 }
 0x254   : > { %v470_v50 = vld [vmem:[%s2186_s3 + $0xa08] sm:$0xff] }
 0x255   : > { %v1569_v0 = vadd.f32 %v1568_v61, %v1058_v59  ;;  %v435_v59 = vld [vmem:[%s2186_s3 + $0x8f0] sm:$0xff] }
 0x257   : > { %v1570_v5 = vadd.f32 %v1569_v0, %v1059_v62  ;;  %v1078_v62 = vsel %vm3249_vm3, %v434_v56, 0.0  ;;  %v453_v56 = vld [vmem:[%s2186_s3 + $0x980] sm:$0xff] }
 0x259   : > { %v1571_v9 = vadd.f32 %v1570_v5, %v1060_v3  ;;  %v1079_v3 = vsel %vm3249_vm3, %v435_v59, 0.0  ;;  %v1096_v59 = vsel %vm3309_vm5, %v452_v53, 0.0  ;;  %v471_v53 = vld [vmem:[%s2186_s3 + $0xa10] sm:$0xff] }
 0x25b   : > { %v1572_v12 = vadd.f32 %v1571_v9, %v1061_v6 }
 0x25d   : > { %v1573_v16 = vadd.f32 %v1572_v12, %v1062_v10  ;;  %v1081_v10 = vsel %vm3279_vm4, %v437_v4, 0.0  ;;  %v456_v4 = vld [vmem:[%s2186_s3 + $0x998] sm:$0xff] }
 0x25f   : > { %v1574_v19 = vadd.f32 %v1573_v16, %v1063_v13  ;;  %v1082_v13 = vsel %vm3279_vm4, %v438_v8, 0.0  ;;  %v1083_v16 = vsel %vm3279_vm4, %v439_v11, 0.0 }
 0x261   : > { %v1575_v22 = vadd.f32 %v1574_v19, %v1064_v17  ;;  %v441_v17 = vld [vmem:[%s2186_s3 + $0x920] sm:$0xff]  ;;  %v1084_v19 = vsel %vm3279_vm4, %v440_v14, 0.0  ;;  %v703_v14 = vadd.s32 312, %v2194_v1 }
 0x263   : > { %v1576_v25 = vadd.f32 %v1575_v22, %v1065_v20  ;;  %v442_v20 = vld [vmem:[%s2186_s3 + $0x928] sm:$0xff]  ;;  %v1085_v22 = vsel %vm3279_vm4, %v441_v17, 0.0  ;;  %v460_v17 = vld [vmem:[%s2186_s3 + $0x9b8] sm:$0xff]  ;;  %vm3369_vm7 = vcmp.lt.s32.totalorder %v703_v14, %v2196_v2 }
 0x264   : > { %v478_v14 = vld [vmem:[%s2186_s3 + $0xa48] sm:$0xff] }
 0x265   : > { %v1577_v28 = vadd.f32 %v1576_v25, %v1066_v23  ;;  %v443_v23 = vld [vmem:[%s2186_s3 + $0x930] sm:$0xff] }
 0x267   : > { %v1578_v31 = vadd.f32 %v1577_v28, %v1067_v26  ;;  %v1086_v26 = vsel %vm3279_vm4, %v442_v20, 0.0  ;;  %v461_v20 = vld [vmem:[%s2186_s3 + $0x9c0] sm:$0xff] }
 0x269   : > { %v1579_v35 = vadd.f32 %v1578_v31, %v1068_v29  ;;  %v1087_v29 = vsel %vm3279_vm4, %v443_v23, 0.0  ;;  %v1104_v23 = vsel %vm3339_vm6, %v460_v17, 0.0  ;;  %v479_v17 = vld [vmem:[%s2186_s3 + $0xa50] sm:$0xff] }
 0x26b   : > { %v1580_v38 = vadd.f32 %v1579_v35, %v1069_v32 }
 0x26d   : > { %v1581_v42 = vadd.f32 %v1580_v38, %v1070_v36  ;;  %v1089_v36 = vsel %vm3309_vm5, %v445_v30, 0.0  ;;  %v464_v30 = vld [vmem:[%s2186_s3 + $0x9d8] sm:$0xff] }
 0x26f   : > { %v1582_v45 = vadd.f32 %v1581_v42, %v1071_v39  ;;  %v1090_v39 = vsel %vm3309_vm5, %v446_v34, 0.0  ;;  %v1091_v42 = vsel %vm3309_vm5, %v447_v37, 0.0 }
 0x271   : > { %v1583_v48 = vadd.f32 %v1582_v45, %v1072_v43  ;;  %v449_v43 = vld [vmem:[%s2186_s3 + $0x960] sm:$0xff]  ;;  %v1092_v45 = vsel %vm3309_vm5, %v448_v40, 0.0  ;;  %v704_v40 = vadd.s32 320, %v2194_v1 }
 0x273   : > { %v1584_v51 = vadd.f32 %v1583_v48, %v1073_v46  ;;  %v450_v46 = vld [vmem:[%s2186_s3 + $0x968] sm:$0xff]  ;;  %v1093_v48 = vsel %vm3309_vm5, %v449_v43, 0.0  ;;  %v468_v43 = vld [vmem:[%s2186_s3 + $0x9f8] sm:$0xff]  ;;  %vm3399_vm8 = vcmp.lt.s32.totalorder %v704_v40, %v2196_v2 }
 0x274   : > { %v486_v40 = vld [vmem:[%s2186_s3 + $0xa88] sm:$0xff] }
 0x275   : > { %v1585_v54 = vadd.f32 %v1584_v51, %v1074_v49  ;;  %v451_v49 = vld [vmem:[%s2186_s3 + $0x970] sm:$0xff] }
 0x277   : > { %v1586_v57 = vadd.f32 %v1585_v54, %v1075_v52  ;;  %v1094_v52 = vsel %vm3309_vm5, %v450_v46, 0.0  ;;  %v469_v46 = vld [vmem:[%s2186_s3 + $0xa00] sm:$0xff] }
 0x279   : > { %v1587_v61 = vadd.f32 %v1586_v57, %v1076_v55  ;;  %v1095_v55 = vsel %vm3309_vm5, %v451_v49, 0.0  ;;  %v1112_v49 = vsel %vm3369_vm7, %v468_v43, 0.0  ;;  %v487_v43 = vld [vmem:[%s2186_s3 + $0xa90] sm:$0xff] }
 0x27b   : > { %v1588_v0 = vadd.f32 %v1587_v61, %v1077_v58 }
 0x27d   : > { %v1589_v6 = vadd.f32 %v1588_v0, %v1078_v62  ;;  %v1097_v62 = vsel %vm3339_vm6, %v453_v56, 0.0  ;;  %v472_v56 = vld [vmem:[%s2186_s3 + $0xa18] sm:$0xff] }
 0x27f   : > { %v1590_v9 = vadd.f32 %v1589_v6, %v1079_v3  ;;  %v1098_v3 = vsel %vm3339_vm6, %v454_v60, 0.0  ;;  %v1099_v6 = vsel %vm3339_vm6, %v455_v63, 0.0 }
 0x281   : > { %v1591_v12 = vadd.f32 %v1590_v9, %v1080_v7  ;;  %v457_v7 = vld [vmem:[%s2186_s3 + $0x9a0] sm:$0xff]  ;;  %v1100_v9 = vsel %vm3339_vm6, %v456_v4, 0.0  ;;  %v705_v4 = vadd.s32 328, %v2194_v1 }
 0x283   : > { %v1592_v15 = vadd.f32 %v1591_v12, %v1081_v10  ;;  %v458_v10 = vld [vmem:[%s2186_s3 + $0x9a8] sm:$0xff]  ;;  %v1101_v12 = vsel %vm3339_vm6, %v457_v7, 0.0  ;;  %v476_v7 = vld [vmem:[%s2186_s3 + $0xa38] sm:$0xff]  ;;  %vm3429_vm9 = vcmp.lt.s32.totalorder %v705_v4, %v2196_v2 }
 0x284   : > { %v494_v4 = vld [vmem:[%s2186_s3 + $0xac8] sm:$0xff] }
 0x285   : > { %v1593_v18 = vadd.f32 %v1592_v15, %v1082_v13  ;;  %v459_v13 = vld [vmem:[%s2186_s3 + $0x9b0] sm:$0xff] }
 0x287   : > { %v1594_v21 = vadd.f32 %v1593_v18, %v1083_v16  ;;  %v1102_v16 = vsel %vm3339_vm6, %v458_v10, 0.0  ;;  %v477_v10 = vld [vmem:[%s2186_s3 + $0xa40] sm:$0xff] }
 0x289   : > { %v1595_v25 = vadd.f32 %v1594_v21, %v1084_v19  ;;  %v1103_v19 = vsel %vm3339_vm6, %v459_v13, 0.0  ;;  %v1120_v13 = vsel %vm3399_vm8, %v476_v7, 0.0  ;;  %v495_v7 = vld [vmem:[%s2186_s3 + $0xad0] sm:$0xff] }
 0x28b   : > { %v1596_v28 = vadd.f32 %v1595_v25, %v1085_v22 }
 0x28d   : > { %v1597_v32 = vadd.f32 %v1596_v28, %v1086_v26  ;;  %v1105_v26 = vsel %vm3369_vm7, %v461_v20, 0.0  ;;  %v480_v20 = vld [vmem:[%s2186_s3 + $0xa58] sm:$0xff] }
 0x28f   : > { %v1598_v35 = vadd.f32 %v1597_v32, %v1087_v29  ;;  %v1106_v29 = vsel %vm3369_vm7, %v462_v24, 0.0  ;;  %v1107_v32 = vsel %vm3369_vm7, %v463_v27, 0.0 }
 0x291   : > { %v1599_v38 = vadd.f32 %v1598_v35, %v1088_v33  ;;  %v465_v33 = vld [vmem:[%s2186_s3 + $0x9e0] sm:$0xff]  ;;  %v1108_v35 = vsel %vm3369_vm7, %v464_v30, 0.0  ;;  %v706_v30 = vadd.s32 336, %v2194_v1 }
 0x293   : > { %v1600_v41 = vadd.f32 %v1599_v38, %v1089_v36  ;;  %v466_v36 = vld [vmem:[%s2186_s3 + $0x9e8] sm:$0xff]  ;;  %v1109_v38 = vsel %vm3369_vm7, %v465_v33, 0.0  ;;  %v484_v33 = vld [vmem:[%s2186_s3 + $0xa78] sm:$0xff]  ;;  %vm3459_vm10 = vcmp.lt.s32.totalorder %v706_v30, %v2196_v2 }
 0x294   : > { %v502_v30 = vld [vmem:[%s2186_s3 + $0xb08] sm:$0xff] }
 0x295   : > { %v1601_v44 = vadd.f32 %v1600_v41, %v1090_v39  ;;  %v467_v39 = vld [vmem:[%s2186_s3 + $0x9f0] sm:$0xff] }
 0x297   : > { %v1602_v47 = vadd.f32 %v1601_v44, %v1091_v42  ;;  %v1110_v42 = vsel %vm3369_vm7, %v466_v36, 0.0  ;;  %v485_v36 = vld [vmem:[%s2186_s3 + $0xa80] sm:$0xff] }
 0x299   : > { %v1603_v51 = vadd.f32 %v1602_v47, %v1092_v45  ;;  %v1111_v45 = vsel %vm3369_vm7, %v467_v39, 0.0  ;;  %v1128_v39 = vsel %vm3429_vm9, %v484_v33, 0.0  ;;  %v503_v33 = vld [vmem:[%s2186_s3 + $0xb10] sm:$0xff] }
 0x29b   : > { %v1604_v54 = vadd.f32 %v1603_v51, %v1093_v48 }
 0x29d   : > { %v1605_v58 = vadd.f32 %v1604_v54, %v1094_v52  ;;  %v1113_v52 = vsel %vm3399_vm8, %v469_v46, 0.0  ;;  %v488_v46 = vld [vmem:[%s2186_s3 + $0xa98] sm:$0xff] }
 0x29f   : > { %v1606_v61 = vadd.f32 %v1605_v58, %v1095_v55  ;;  %v1114_v55 = vsel %vm3399_vm8, %v470_v50, 0.0  ;;  %v1115_v58 = vsel %vm3399_vm8, %v471_v53, 0.0 }
 0x2a1   : > { %v1607_v0 = vadd.f32 %v1606_v61, %v1096_v59  ;;  %v473_v59 = vld [vmem:[%s2186_s3 + $0xa20] sm:$0xff]  ;;  %v1116_v61 = vsel %vm3399_vm8, %v472_v56, 0.0  ;;  %v707_v56 = vadd.s32 344, %v2194_v1 }
 0x2a3   : > { %v1608_v5 = vadd.f32 %v1607_v0, %v1097_v62  ;;  %v474_v62 = vld [vmem:[%s2186_s3 + $0xa28] sm:$0xff]  ;;  %v1117_v0 = vsel %vm3399_vm8, %v473_v59, 0.0  ;;  %v492_v59 = vld [vmem:[%s2186_s3 + $0xab8] sm:$0xff]  ;;  %vm3489_vm11 = vcmp.lt.s32.totalorder %v707_v56, %v2196_v2 }
 0x2a4   : > { %v510_v56 = vld [vmem:[%s2186_s3 + $0xb48] sm:$0xff] }
 0x2a5   : > { %v1609_v8 = vadd.f32 %v1608_v5, %v1098_v3  ;;  %v475_v3 = vld [vmem:[%s2186_s3 + $0xa30] sm:$0xff] }
 0x2a7   : > { %v1610_v11 = vadd.f32 %v1609_v8, %v1099_v6  ;;  %v1118_v6 = vsel %vm3399_vm8, %v474_v62, 0.0  ;;  %v493_v62 = vld [vmem:[%s2186_s3 + $0xac0] sm:$0xff] }
 0x2a9   : > { %v1611_v15 = vadd.f32 %v1610_v11, %v1100_v9  ;;  %v1119_v9 = vsel %vm3399_vm8, %v475_v3, 0.0  ;;  %v1136_v3 = vsel %vm3459_vm10, %v492_v59, 0.0  ;;  %v511_v59 = vld [vmem:[%s2186_s3 + $0xb50] sm:$0xff] }
 0x2ab   : > { %v1612_v18 = vadd.f32 %v1611_v15, %v1101_v12 }
 0x2ad   : > { %v1613_v22 = vadd.f32 %v1612_v18, %v1102_v16  ;;  %v1121_v16 = vsel %vm3429_vm9, %v477_v10, 0.0  ;;  %v496_v10 = vld [vmem:[%s2186_s3 + $0xad8] sm:$0xff] }
 0x2af   : > { %v1614_v25 = vadd.f32 %v1613_v22, %v1103_v19  ;;  %v1122_v19 = vsel %vm3429_vm9, %v478_v14, 0.0  ;;  %v1123_v22 = vsel %vm3429_vm9, %v479_v17, 0.0 }
 0x2b1   : > { %v1615_v28 = vadd.f32 %v1614_v25, %v1104_v23  ;;  %v481_v23 = vld [vmem:[%s2186_s3 + $0xa60] sm:$0xff]  ;;  %v1124_v25 = vsel %vm3429_vm9, %v480_v20, 0.0  ;;  %v708_v20 = vadd.s32 352, %v2194_v1 }
 0x2b3   : > { %v1616_v31 = vadd.f32 %v1615_v28, %v1105_v26  ;;  %v482_v26 = vld [vmem:[%s2186_s3 + $0xa68] sm:$0xff]  ;;  %v1125_v28 = vsel %vm3429_vm9, %v481_v23, 0.0  ;;  %v500_v23 = vld [vmem:[%s2186_s3 + $0xaf8] sm:$0xff]  ;;  %vm3519_vm12 = vcmp.lt.s32.totalorder %v708_v20, %v2196_v2 }
 0x2b4   : > { %v518_v20 = vld [vmem:[%s2186_s3 + $0xb88] sm:$0xff] }
 0x2b5   : > { %v1617_v34 = vadd.f32 %v1616_v31, %v1106_v29  ;;  %v483_v29 = vld [vmem:[%s2186_s3 + $0xa70] sm:$0xff] }
 0x2b7   : > { %v1618_v37 = vadd.f32 %v1617_v34, %v1107_v32  ;;  %v1126_v32 = vsel %vm3429_vm9, %v482_v26, 0.0  ;;  %v501_v26 = vld [vmem:[%s2186_s3 + $0xb00] sm:$0xff] }
 0x2b9   : > { %v1619_v41 = vadd.f32 %v1618_v37, %v1108_v35  ;;  %v1127_v35 = vsel %vm3429_vm9, %v483_v29, 0.0  ;;  %v1144_v29 = vsel %vm3489_vm11, %v500_v23, 0.0  ;;  %v519_v23 = vld [vmem:[%s2186_s3 + $0xb90] sm:$0xff] }
 0x2bb   : > { %v1620_v44 = vadd.f32 %v1619_v41, %v1109_v38 }
 0x2bd   : > { %v1621_v48 = vadd.f32 %v1620_v44, %v1110_v42  ;;  %v1129_v42 = vsel %vm3459_vm10, %v485_v36, 0.0  ;;  %v504_v36 = vld [vmem:[%s2186_s3 + $0xb18] sm:$0xff] }
 0x2bf   : > { %v1622_v51 = vadd.f32 %v1621_v48, %v1111_v45  ;;  %v1130_v45 = vsel %vm3459_vm10, %v486_v40, 0.0  ;;  %v1131_v48 = vsel %vm3459_vm10, %v487_v43, 0.0 }
 0x2c1   : > { %v1623_v54 = vadd.f32 %v1622_v51, %v1112_v49  ;;  %v489_v49 = vld [vmem:[%s2186_s3 + $0xaa0] sm:$0xff]  ;;  %v1132_v51 = vsel %vm3459_vm10, %v488_v46, 0.0  ;;  %v709_v46 = vadd.s32 360, %v2194_v1 }
 0x2c3   : > { %v1624_v57 = vadd.f32 %v1623_v54, %v1113_v52  ;;  %v490_v52 = vld [vmem:[%s2186_s3 + $0xaa8] sm:$0xff]  ;;  %v1133_v54 = vsel %vm3459_vm10, %v489_v49, 0.0  ;;  %v508_v49 = vld [vmem:[%s2186_s3 + $0xb38] sm:$0xff]  ;;  %vm3549_vm13 = vcmp.lt.s32.totalorder %v709_v46, %v2196_v2 }
 0x2c4   : > { %v526_v46 = vld [vmem:[%s2186_s3 + $0xbc8] sm:$0xff] }
 0x2c5   : > { %v1625_v60 = vadd.f32 %v1624_v57, %v1114_v55  ;;  %v491_v55 = vld [vmem:[%s2186_s3 + $0xab0] sm:$0xff] }
 0x2c7   : > { %v1626_v63 = vadd.f32 %v1625_v60, %v1115_v58  ;;  %v1134_v58 = vsel %vm3459_vm10, %v490_v52, 0.0  ;;  %v509_v52 = vld [vmem:[%s2186_s3 + $0xb40] sm:$0xff] }
 0x2c9   : > { %v1627_v5 = vadd.f32 %v1626_v63, %v1116_v61  ;;  %v1135_v61 = vsel %vm3459_vm10, %v491_v55, 0.0  ;;  %v1152_v55 = vsel %vm3519_vm12, %v508_v49, 0.0  ;;  %v527_v49 = vld [vmem:[%s2186_s3 + $0xbd0] sm:$0xff] }
 0x2cb   : > { %v1628_v8 = vadd.f32 %v1627_v5, %v1117_v0 }
 0x2cd   : > { %v1629_v12 = vadd.f32 %v1628_v8, %v1118_v6  ;;  %v1137_v6 = vsel %vm3489_vm11, %v493_v62, 0.0  ;;  %v512_v62 = vld [vmem:[%s2186_s3 + $0xb58] sm:$0xff] }
 0x2cf   : > { %v1630_v15 = vadd.f32 %v1629_v12, %v1119_v9  ;;  %v1138_v9 = vsel %vm3489_vm11, %v494_v4, 0.0  ;;  %v1139_v12 = vsel %vm3489_vm11, %v495_v7, 0.0 }
 0x2d1   : > { %v1631_v18 = vadd.f32 %v1630_v15, %v1120_v13  ;;  %v497_v13 = vld [vmem:[%s2186_s3 + $0xae0] sm:$0xff]  ;;  %v1140_v15 = vsel %vm3489_vm11, %v496_v10, 0.0  ;;  %v710_v10 = vadd.s32 368, %v2194_v1 }
 0x2d3   : > { %v1632_v21 = vadd.f32 %v1631_v18, %v1121_v16  ;;  %v498_v16 = vld [vmem:[%s2186_s3 + $0xae8] sm:$0xff]  ;;  %v1141_v18 = vsel %vm3489_vm11, %v497_v13, 0.0  ;;  %v516_v13 = vld [vmem:[%s2186_s3 + $0xb78] sm:$0xff]  ;;  %vm3579_vm14 = vcmp.lt.s32.totalorder %v710_v10, %v2196_v2 }
 0x2d4   : > { %v534_v10 = vld [vmem:[%s2186_s3 + $0xc08] sm:$0xff] }
 0x2d5   : > { %v1633_v24 = vadd.f32 %v1632_v21, %v1122_v19  ;;  %v499_v19 = vld [vmem:[%s2186_s3 + $0xaf0] sm:$0xff] }
 0x2d7   : > { %v1634_v27 = vadd.f32 %v1633_v24, %v1123_v22  ;;  %v1142_v22 = vsel %vm3489_vm11, %v498_v16, 0.0  ;;  %v517_v16 = vld [vmem:[%s2186_s3 + $0xb80] sm:$0xff] }
 0x2d9   : > { %v1635_v31 = vadd.f32 %v1634_v27, %v1124_v25  ;;  %v1143_v25 = vsel %vm3489_vm11, %v499_v19, 0.0  ;;  %v1160_v19 = vsel %vm3549_vm13, %v516_v13, 0.0  ;;  %v535_v13 = vld [vmem:[%s2186_s3 + $0xc10] sm:$0xff] }
 0x2db   : > { %v1636_v34 = vadd.f32 %v1635_v31, %v1125_v28 }
 0x2dd   : > { %v1637_v38 = vadd.f32 %v1636_v34, %v1126_v32  ;;  %v1145_v32 = vsel %vm3519_vm12, %v501_v26, 0.0  ;;  %v520_v26 = vld [vmem:[%s2186_s3 + $0xb98] sm:$0xff] }
 0x2df   : > { %v1638_v41 = vadd.f32 %v1637_v38, %v1127_v35  ;;  %v1146_v35 = vsel %vm3519_vm12, %v502_v30, 0.0  ;;  %v1147_v38 = vsel %vm3519_vm12, %v503_v33, 0.0 }
 0x2e1   : > { %v1639_v44 = vadd.f32 %v1638_v41, %v1128_v39  ;;  %v505_v39 = vld [vmem:[%s2186_s3 + $0xb20] sm:$0xff]  ;;  %v1148_v41 = vsel %vm3519_vm12, %v504_v36, 0.0  ;;  %v711_v36 = vadd.s32 376, %v2194_v1 }
 0x2e3   : > { %v1640_v47 = vadd.f32 %v1639_v44, %v1129_v42  ;;  %v506_v42 = vld [vmem:[%s2186_s3 + $0xb28] sm:$0xff]  ;;  %v1149_v44 = vsel %vm3519_vm12, %v505_v39, 0.0  ;;  %v524_v39 = vld [vmem:[%s2186_s3 + $0xbb8] sm:$0xff]  ;;  %vm3609_vm15 = vcmp.lt.s32.totalorder %v711_v36, %v2196_v2 }
 0x2e4   : > { %v542_v36 = vld [vmem:[%s2186_s3 + $0xc48] sm:$0xff] }
 0x2e5   : > { %v1641_v50 = vadd.f32 %v1640_v47, %v1130_v45  ;;  %v507_v45 = vld [vmem:[%s2186_s3 + $0xb30] sm:$0xff] }
 0x2e7   : > { %v1642_v53 = vadd.f32 %v1641_v50, %v1131_v48  ;;  %v1150_v48 = vsel %vm3519_vm12, %v506_v42, 0.0  ;;  %v525_v42 = vld [vmem:[%s2186_s3 + $0xbc0] sm:$0xff] }
 0x2e9   : > { %v1643_v57 = vadd.f32 %v1642_v53, %v1132_v51  ;;  %v1151_v51 = vsel %vm3519_vm12, %v507_v45, 0.0  ;;  %v1168_v45 = vsel %vm3579_vm14, %v524_v39, 0.0  ;;  %v543_v39 = vld [vmem:[%s2186_s3 + $0xc50] sm:$0xff] }
 0x2eb   : > { %v1644_v60 = vadd.f32 %v1643_v57, %v1133_v54 }
 0x2ed   : > { %v1645_v0 = vadd.f32 %v1644_v60, %v1134_v58  ;;  %v1153_v58 = vsel %vm3549_vm13, %v509_v52, 0.0  ;;  %v528_v52 = vld [vmem:[%s2186_s3 + $0xbd8] sm:$0xff] }
 0x2ef   : > { %v1646_v5 = vadd.f32 %v1645_v0, %v1135_v61  ;;  %v1154_v61 = vsel %vm3549_vm13, %v510_v56, 0.0  ;;  %v1155_v0 = vsel %vm3549_vm13, %v511_v59, 0.0 }
 0x2f1   : > { %v1647_v8 = vadd.f32 %v1646_v5, %v1136_v3  ;;  %v513_v3 = vld [vmem:[%s2186_s3 + $0xb60] sm:$0xff]  ;;  %v1156_v5 = vsel %vm3549_vm13, %v512_v62, 0.0  ;;  %v712_v62 = vadd.s32 384, %v2194_v1 }
 0x2f3   : > { %v1648_v11 = vadd.f32 %v1647_v8, %v1137_v6  ;;  %v514_v6 = vld [vmem:[%s2186_s3 + $0xb68] sm:$0xff]  ;;  %v1157_v8 = vsel %vm3549_vm13, %v513_v3, 0.0  ;;  %v532_v3 = vld [vmem:[%s2186_s3 + $0xbf8] sm:$0xff]  ;;  %vm3639_vm0 = vcmp.lt.s32.totalorder %v712_v62, %v2196_v2 }
 0x2f4   : > { %v550_v62 = vld [vmem:[%s2186_s3 + $0xc88] sm:$0xff] }
 0x2f5   : > { %v1649_v14 = vadd.f32 %v1648_v11, %v1138_v9  ;;  %v515_v9 = vld [vmem:[%s2186_s3 + $0xb70] sm:$0xff] }
 0x2f7   : > { %v1650_v17 = vadd.f32 %v1649_v14, %v1139_v12  ;;  %v1158_v12 = vsel %vm3549_vm13, %v514_v6, 0.0  ;;  %v533_v6 = vld [vmem:[%s2186_s3 + $0xc00] sm:$0xff] }
 0x2f9   : > { %v1651_v21 = vadd.f32 %v1650_v17, %v1140_v15  ;;  %v1159_v15 = vsel %vm3549_vm13, %v515_v9, 0.0  ;;  %v1176_v9 = vsel %vm3609_vm15, %v532_v3, 0.0  ;;  %v551_v3 = vld [vmem:[%s2186_s3 + $0xc90] sm:$0xff] }
 0x2fb   : > { %v1652_v24 = vadd.f32 %v1651_v21, %v1141_v18 }
 0x2fd   : > { %v1653_v28 = vadd.f32 %v1652_v24, %v1142_v22  ;;  %v1161_v22 = vsel %vm3579_vm14, %v517_v16, 0.0  ;;  %v536_v16 = vld [vmem:[%s2186_s3 + $0xc18] sm:$0xff] }
 0x2ff   : > { %v1654_v31 = vadd.f32 %v1653_v28, %v1143_v25  ;;  %v1162_v25 = vsel %vm3579_vm14, %v518_v20, 0.0  ;;  %v1163_v28 = vsel %vm3579_vm14, %v519_v23, 0.0 }
 0x301   : > { %v1655_v34 = vadd.f32 %v1654_v31, %v1144_v29  ;;  %v521_v29 = vld [vmem:[%s2186_s3 + $0xba0] sm:$0xff]  ;;  %v1164_v31 = vsel %vm3579_vm14, %v520_v26, 0.0  ;;  %v713_v26 = vadd.s32 392, %v2194_v1 }
 0x303   : > { %v1656_v37 = vadd.f32 %v1655_v34, %v1145_v32  ;;  %v522_v32 = vld [vmem:[%s2186_s3 + $0xba8] sm:$0xff]  ;;  %v1165_v34 = vsel %vm3579_vm14, %v521_v29, 0.0  ;;  %v540_v29 = vld [vmem:[%s2186_s3 + $0xc38] sm:$0xff]  ;;  %vm3669_vm1 = vcmp.lt.s32.totalorder %v713_v26, %v2196_v2 }
 0x304   : > { %v558_v26 = vld [vmem:[%s2186_s3 + $0xcc8] sm:$0xff] }
 0x305   : > { %v1657_v40 = vadd.f32 %v1656_v37, %v1146_v35  ;;  %v523_v35 = vld [vmem:[%s2186_s3 + $0xbb0] sm:$0xff] }
 0x307   : > { %v1658_v43 = vadd.f32 %v1657_v40, %v1147_v38  ;;  %v1166_v38 = vsel %vm3579_vm14, %v522_v32, 0.0  ;;  %v541_v32 = vld [vmem:[%s2186_s3 + $0xc40] sm:$0xff] }
 0x309   : > { %v1659_v47 = vadd.f32 %v1658_v43, %v1148_v41  ;;  %v1167_v41 = vsel %vm3579_vm14, %v523_v35, 0.0  ;;  %v1184_v35 = vsel %vm3639_vm0, %v540_v29, 0.0  ;;  %v559_v29 = vld [vmem:[%s2186_s3 + $0xcd0] sm:$0xff] }
 0x30b   : > { %v1660_v50 = vadd.f32 %v1659_v47, %v1149_v44 }
 0x30d   : > { %v1661_v54 = vadd.f32 %v1660_v50, %v1150_v48  ;;  %v1169_v48 = vsel %vm3609_vm15, %v525_v42, 0.0  ;;  %v544_v42 = vld [vmem:[%s2186_s3 + $0xc58] sm:$0xff] }
 0x30f   : > { %v1662_v57 = vadd.f32 %v1661_v54, %v1151_v51  ;;  %v1170_v51 = vsel %vm3609_vm15, %v526_v46, 0.0  ;;  %v1171_v54 = vsel %vm3609_vm15, %v527_v49, 0.0 }
 0x311   : > { %v1663_v60 = vadd.f32 %v1662_v57, %v1152_v55  ;;  %v529_v55 = vld [vmem:[%s2186_s3 + $0xbe0] sm:$0xff]  ;;  %v1172_v57 = vsel %vm3609_vm15, %v528_v52, 0.0  ;;  %v714_v52 = vadd.s32 400, %v2194_v1 }
 0x313   : > { %v1664_v63 = vadd.f32 %v1663_v60, %v1153_v58  ;;  %v530_v58 = vld [vmem:[%s2186_s3 + $0xbe8] sm:$0xff]  ;;  %v1173_v60 = vsel %vm3609_vm15, %v529_v55, 0.0  ;;  %v548_v55 = vld [vmem:[%s2186_s3 + $0xc78] sm:$0xff]  ;;  %vm3699_vm2 = vcmp.lt.s32.totalorder %v714_v52, %v2196_v2 }
 0x314   : > { %v566_v52 = vld [vmem:[%s2186_s3 + $0xd08] sm:$0xff] }
 0x315   : > { %v1665_v4 = vadd.f32 %v1664_v63, %v1154_v61  ;;  %v531_v61 = vld [vmem:[%s2186_s3 + $0xbf0] sm:$0xff] }
 0x317   : > { %v1666_v7 = vadd.f32 %v1665_v4, %v1155_v0  ;;  %v1174_v0 = vsel %vm3609_vm15, %v530_v58, 0.0  ;;  %v549_v58 = vld [vmem:[%s2186_s3 + $0xc80] sm:$0xff] }
 0x319   : > { %v1667_v11 = vadd.f32 %v1666_v7, %v1156_v5  ;;  %v1175_v5 = vsel %vm3609_vm15, %v531_v61, 0.0  ;;  %v1192_v61 = vsel %vm3669_vm1, %v548_v55, 0.0  ;;  %v567_v55 = vld [vmem:[%s2186_s3 + $0xd10] sm:$0xff] }
 0x31b   : > { %v1668_v14 = vadd.f32 %v1667_v11, %v1157_v8 }
 0x31d   : > { %v1669_v18 = vadd.f32 %v1668_v14, %v1158_v12  ;;  %v1177_v12 = vsel %vm3639_vm0, %v533_v6, 0.0  ;;  %v552_v6 = vld [vmem:[%s2186_s3 + $0xc98] sm:$0xff] }
 0x31f   : > { %v1670_v21 = vadd.f32 %v1669_v18, %v1159_v15  ;;  %v1178_v15 = vsel %vm3639_vm0, %v534_v10, 0.0  ;;  %v1179_v18 = vsel %vm3639_vm0, %v535_v13, 0.0 }
 0x321   : > { %v1671_v24 = vadd.f32 %v1670_v21, %v1160_v19  ;;  %v537_v19 = vld [vmem:[%s2186_s3 + $0xc20] sm:$0xff]  ;;  %v1180_v21 = vsel %vm3639_vm0, %v536_v16, 0.0  ;;  %v715_v16 = vadd.s32 408, %v2194_v1 }
 0x323   : > { %v1672_v27 = vadd.f32 %v1671_v24, %v1161_v22  ;;  %v538_v22 = vld [vmem:[%s2186_s3 + $0xc28] sm:$0xff]  ;;  %v1181_v24 = vsel %vm3639_vm0, %v537_v19, 0.0  ;;  %v556_v19 = vld [vmem:[%s2186_s3 + $0xcb8] sm:$0xff]  ;;  %vm3729_vm3 = vcmp.lt.s32.totalorder %v715_v16, %v2196_v2 }
 0x324   : > { %v574_v16 = vld [vmem:[%s2186_s3 + $0xd48] sm:$0xff] }
 0x325   : > { %v1673_v30 = vadd.f32 %v1672_v27, %v1162_v25  ;;  %v539_v25 = vld [vmem:[%s2186_s3 + $0xc30] sm:$0xff] }
 0x327   : > { %v1674_v33 = vadd.f32 %v1673_v30, %v1163_v28  ;;  %v1182_v28 = vsel %vm3639_vm0, %v538_v22, 0.0  ;;  %v557_v22 = vld [vmem:[%s2186_s3 + $0xcc0] sm:$0xff] }
 0x329   : > { %v1675_v37 = vadd.f32 %v1674_v33, %v1164_v31  ;;  %v1183_v31 = vsel %vm3639_vm0, %v539_v25, 0.0  ;;  %v1200_v25 = vsel %vm3699_vm2, %v556_v19, 0.0  ;;  %v575_v19 = vld [vmem:[%s2186_s3 + $0xd50] sm:$0xff] }
 0x32b   : > { %v1676_v40 = vadd.f32 %v1675_v37, %v1165_v34 }
 0x32d   : > { %v1677_v44 = vadd.f32 %v1676_v40, %v1166_v38  ;;  %v1185_v38 = vsel %vm3669_vm1, %v541_v32, 0.0  ;;  %v560_v32 = vld [vmem:[%s2186_s3 + $0xcd8] sm:$0xff] }
 0x32f   : > { %v1678_v47 = vadd.f32 %v1677_v44, %v1167_v41  ;;  %v1186_v41 = vsel %vm3669_vm1, %v542_v36, 0.0  ;;  %v1187_v44 = vsel %vm3669_vm1, %v543_v39, 0.0 }
 0x331   : > { %v1679_v50 = vadd.f32 %v1678_v47, %v1168_v45  ;;  %v545_v45 = vld [vmem:[%s2186_s3 + $0xc60] sm:$0xff]  ;;  %v1188_v47 = vsel %vm3669_vm1, %v544_v42, 0.0  ;;  %v716_v42 = vadd.s32 416, %v2194_v1 }
 0x333   : > { %v1680_v53 = vadd.f32 %v1679_v50, %v1169_v48  ;;  %v546_v48 = vld [vmem:[%s2186_s3 + $0xc68] sm:$0xff]  ;;  %v1189_v50 = vsel %vm3669_vm1, %v545_v45, 0.0  ;;  %v564_v45 = vld [vmem:[%s2186_s3 + $0xcf8] sm:$0xff]  ;;  %vm3759_vm4 = vcmp.lt.s32.totalorder %v716_v42, %v2196_v2 }
 0x334   : > { %v582_v42 = vld [vmem:[%s2186_s3 + $0xd88] sm:$0xff] }
 0x335   : > { %v1681_v56 = vadd.f32 %v1680_v53, %v1170_v51  ;;  %v547_v51 = vld [vmem:[%s2186_s3 + $0xc70] sm:$0xff] }
 0x337   : > { %v1682_v59 = vadd.f32 %v1681_v56, %v1171_v54  ;;  %v1190_v54 = vsel %vm3669_vm1, %v546_v48, 0.0  ;;  %v565_v48 = vld [vmem:[%s2186_s3 + $0xd00] sm:$0xff] }
 0x339   : > { %v1683_v63 = vadd.f32 %v1682_v59, %v1172_v57  ;;  %v1191_v57 = vsel %vm3669_vm1, %v547_v51, 0.0  ;;  %v1208_v51 = vsel %vm3729_vm3, %v564_v45, 0.0  ;;  %v583_v45 = vld [vmem:[%s2186_s3 + $0xd90] sm:$0xff] }
 0x33b   : > { %v1684_v4 = vadd.f32 %v1683_v63, %v1173_v60 }
 0x33d   : > { %v1685_v8 = vadd.f32 %v1684_v4, %v1174_v0  ;;  %v1193_v0 = vsel %vm3699_vm2, %v549_v58, 0.0  ;;  %v568_v58 = vld [vmem:[%s2186_s3 + $0xd18] sm:$0xff] }
 0x33f   : > { %v1686_v11 = vadd.f32 %v1685_v8, %v1175_v5  ;;  %v1194_v5 = vsel %vm3699_vm2, %v550_v62, 0.0  ;;  %v1195_v8 = vsel %vm3699_vm2, %v551_v3, 0.0 }
 0x341   : > { %v1687_v14 = vadd.f32 %v1686_v11, %v1176_v9  ;;  %v553_v9 = vld [vmem:[%s2186_s3 + $0xca0] sm:$0xff]  ;;  %v1196_v11 = vsel %vm3699_vm2, %v552_v6, 0.0  ;;  %v717_v6 = vadd.s32 424, %v2194_v1 }
 0x343   : > { %v1688_v17 = vadd.f32 %v1687_v14, %v1177_v12  ;;  %v554_v12 = vld [vmem:[%s2186_s3 + $0xca8] sm:$0xff]  ;;  %v1197_v14 = vsel %vm3699_vm2, %v553_v9, 0.0  ;;  %v572_v9 = vld [vmem:[%s2186_s3 + $0xd38] sm:$0xff]  ;;  %vm3789_vm5 = vcmp.lt.s32.totalorder %v717_v6, %v2196_v2 }
 0x344   : > { %v590_v6 = vld [vmem:[%s2186_s3 + $0xdc8] sm:$0xff] }
 0x345   : > { %v1689_v20 = vadd.f32 %v1688_v17, %v1178_v15  ;;  %v555_v15 = vld [vmem:[%s2186_s3 + $0xcb0] sm:$0xff] }
 0x347   : > { %v1690_v23 = vadd.f32 %v1689_v20, %v1179_v18  ;;  %v1198_v18 = vsel %vm3699_vm2, %v554_v12, 0.0  ;;  %v573_v12 = vld [vmem:[%s2186_s3 + $0xd40] sm:$0xff] }
 0x349   : > { %v1691_v27 = vadd.f32 %v1690_v23, %v1180_v21  ;;  %v1199_v21 = vsel %vm3699_vm2, %v555_v15, 0.0  ;;  %v1216_v15 = vsel %vm3759_vm4, %v572_v9, 0.0  ;;  %v591_v9 = vld [vmem:[%s2186_s3 + $0xdd0] sm:$0xff] }
 0x34b   : > { %v1692_v30 = vadd.f32 %v1691_v27, %v1181_v24 }
 0x34d   : > { %v1693_v34 = vadd.f32 %v1692_v30, %v1182_v28  ;;  %v1201_v28 = vsel %vm3729_vm3, %v557_v22, 0.0  ;;  %v576_v22 = vld [vmem:[%s2186_s3 + $0xd58] sm:$0xff] }
 0x34f   : > { %v1694_v37 = vadd.f32 %v1693_v34, %v1183_v31  ;;  %v1202_v31 = vsel %vm3729_vm3, %v558_v26, 0.0  ;;  %v1203_v34 = vsel %vm3729_vm3, %v559_v29, 0.0 }
 0x351   : > { %v1695_v40 = vadd.f32 %v1694_v37, %v1184_v35  ;;  %v561_v35 = vld [vmem:[%s2186_s3 + $0xce0] sm:$0xff]  ;;  %v1204_v37 = vsel %vm3729_vm3, %v560_v32, 0.0  ;;  %v718_v32 = vadd.s32 432, %v2194_v1 }
 0x353   : > { %v1696_v43 = vadd.f32 %v1695_v40, %v1185_v38  ;;  %v562_v38 = vld [vmem:[%s2186_s3 + $0xce8] sm:$0xff]  ;;  %v1205_v40 = vsel %vm3729_vm3, %v561_v35, 0.0  ;;  %v580_v35 = vld [vmem:[%s2186_s3 + $0xd78] sm:$0xff]  ;;  %vm3819_vm6 = vcmp.lt.s32.totalorder %v718_v32, %v2196_v2 }
 0x354   : > { %v598_v32 = vld [vmem:[%s2186_s3 + $0xe08] sm:$0xff] }
 0x355   : > { %v1697_v46 = vadd.f32 %v1696_v43, %v1186_v41  ;;  %v563_v41 = vld [vmem:[%s2186_s3 + $0xcf0] sm:$0xff] }
 0x357   : > { %v1698_v49 = vadd.f32 %v1697_v46, %v1187_v44  ;;  %v1206_v44 = vsel %vm3729_vm3, %v562_v38, 0.0  ;;  %v581_v38 = vld [vmem:[%s2186_s3 + $0xd80] sm:$0xff] }
 0x359   : > { %v1699_v53 = vadd.f32 %v1698_v49, %v1188_v47  ;;  %v1207_v47 = vsel %vm3729_vm3, %v563_v41, 0.0  ;;  %v1224_v41 = vsel %vm3789_vm5, %v580_v35, 0.0  ;;  %v599_v35 = vld [vmem:[%s2186_s3 + $0xe10] sm:$0xff] }
 0x35b   : > { %v1700_v56 = vadd.f32 %v1699_v53, %v1189_v50 }
 0x35d   : > { %v1701_v60 = vadd.f32 %v1700_v56, %v1190_v54  ;;  %v1209_v54 = vsel %vm3759_vm4, %v565_v48, 0.0  ;;  %v584_v48 = vld [vmem:[%s2186_s3 + $0xd98] sm:$0xff] }
 0x35f   : > { %v1702_v63 = vadd.f32 %v1701_v60, %v1191_v57  ;;  %v1210_v57 = vsel %vm3759_vm4, %v566_v52, 0.0  ;;  %v1211_v60 = vsel %vm3759_vm4, %v567_v55, 0.0 }
 0x361   : > { %v1703_v4 = vadd.f32 %v1702_v63, %v1192_v61  ;;  %v569_v61 = vld [vmem:[%s2186_s3 + $0xd20] sm:$0xff]  ;;  %v1212_v63 = vsel %vm3759_vm4, %v568_v58, 0.0  ;;  %v719_v58 = vadd.s32 440, %v2194_v1 }
 0x363   : > { %v1704_v7 = vadd.f32 %v1703_v4, %v1193_v0  ;;  %v570_v0 = vld [vmem:[%s2186_s3 + $0xd28] sm:$0xff]  ;;  %v1213_v4 = vsel %vm3759_vm4, %v569_v61, 0.0  ;;  %v588_v61 = vld [vmem:[%s2186_s3 + $0xdb8] sm:$0xff]  ;;  %vm3849_vm7 = vcmp.lt.s32.totalorder %v719_v58, %v2196_v2 }
 0x364   : > { %v606_v58 = vld [vmem:[%s2186_s3 + $0xe48] sm:$0xff] }
 0x365   : > { %v1705_v10 = vadd.f32 %v1704_v7, %v1194_v5  ;;  %v571_v5 = vld [vmem:[%s2186_s3 + $0xd30] sm:$0xff] }
 0x367   : > { %v1706_v13 = vadd.f32 %v1705_v10, %v1195_v8  ;;  %v1214_v8 = vsel %vm3759_vm4, %v570_v0, 0.0  ;;  %v589_v0 = vld [vmem:[%s2186_s3 + $0xdc0] sm:$0xff] }
 0x369   : > { %v1707_v17 = vadd.f32 %v1706_v13, %v1196_v11  ;;  %v1215_v11 = vsel %vm3759_vm4, %v571_v5, 0.0  ;;  %v1232_v5 = vsel %vm3819_vm6, %v588_v61, 0.0  ;;  %v607_v61 = vld [vmem:[%s2186_s3 + $0xe50] sm:$0xff] }
 0x36b   : > { %v1708_v20 = vadd.f32 %v1707_v17, %v1197_v14 }
 0x36d   : > { %v1709_v24 = vadd.f32 %v1708_v20, %v1198_v18  ;;  %v1217_v18 = vsel %vm3789_vm5, %v573_v12, 0.0  ;;  %v592_v12 = vld [vmem:[%s2186_s3 + $0xdd8] sm:$0xff] }
 0x36f   : > { %v1710_v27 = vadd.f32 %v1709_v24, %v1199_v21  ;;  %v1218_v21 = vsel %vm3789_vm5, %v574_v16, 0.0  ;;  %v1219_v24 = vsel %vm3789_vm5, %v575_v19, 0.0 }
 0x371   : > { %v1711_v30 = vadd.f32 %v1710_v27, %v1200_v25  ;;  %v577_v25 = vld [vmem:[%s2186_s3 + $0xd60] sm:$0xff]  ;;  %v1220_v27 = vsel %vm3789_vm5, %v576_v22, 0.0  ;;  %v720_v22 = vadd.s32 448, %v2194_v1 }
 0x373   : > { %v1712_v33 = vadd.f32 %v1711_v30, %v1201_v28  ;;  %v578_v28 = vld [vmem:[%s2186_s3 + $0xd68] sm:$0xff]  ;;  %v1221_v30 = vsel %vm3789_vm5, %v577_v25, 0.0  ;;  %v596_v25 = vld [vmem:[%s2186_s3 + $0xdf8] sm:$0xff]  ;;  %vm3879_vm8 = vcmp.lt.s32.totalorder %v720_v22, %v2196_v2 }
 0x374   : > { %v614_v22 = vld [vmem:[%s2186_s3 + $0xe88] sm:$0xff] }
 0x375   : > { %v1713_v36 = vadd.f32 %v1712_v33, %v1202_v31  ;;  %v579_v31 = vld [vmem:[%s2186_s3 + $0xd70] sm:$0xff] }
 0x377   : > { %v1714_v39 = vadd.f32 %v1713_v36, %v1203_v34  ;;  %v1222_v34 = vsel %vm3789_vm5, %v578_v28, 0.0  ;;  %v597_v28 = vld [vmem:[%s2186_s3 + $0xe00] sm:$0xff] }
 0x379   : > { %v1715_v43 = vadd.f32 %v1714_v39, %v1204_v37  ;;  %v1223_v37 = vsel %vm3789_vm5, %v579_v31, 0.0  ;;  %v1240_v31 = vsel %vm3849_vm7, %v596_v25, 0.0  ;;  %v615_v25 = vld [vmem:[%s2186_s3 + $0xe90] sm:$0xff] }
 0x37b   : > { %v1716_v46 = vadd.f32 %v1715_v43, %v1205_v40 }
 0x37d   : > { %v1717_v50 = vadd.f32 %v1716_v46, %v1206_v44  ;;  %v1225_v44 = vsel %vm3819_vm6, %v581_v38, 0.0  ;;  %v600_v38 = vld [vmem:[%s2186_s3 + $0xe18] sm:$0xff] }
 0x37f   : > { %v1718_v53 = vadd.f32 %v1717_v50, %v1207_v47  ;;  %v1226_v47 = vsel %vm3819_vm6, %v582_v42, 0.0  ;;  %v1227_v50 = vsel %vm3819_vm6, %v583_v45, 0.0 }
 0x381   : > { %v1719_v56 = vadd.f32 %v1718_v53, %v1208_v51  ;;  %v585_v51 = vld [vmem:[%s2186_s3 + $0xda0] sm:$0xff]  ;;  %v1228_v53 = vsel %vm3819_vm6, %v584_v48, 0.0  ;;  %v721_v48 = vadd.s32 456, %v2194_v1 }
 0x383   : > { %v1720_v59 = vadd.f32 %v1719_v56, %v1209_v54  ;;  %v586_v54 = vld [vmem:[%s2186_s3 + $0xda8] sm:$0xff]  ;;  %v1229_v56 = vsel %vm3819_vm6, %v585_v51, 0.0  ;;  %v604_v51 = vld [vmem:[%s2186_s3 + $0xe38] sm:$0xff]  ;;  %vm3909_vm9 = vcmp.lt.s32.totalorder %v721_v48, %v2196_v2 }
 0x384   : > { %v622_v48 = vld [vmem:[%s2186_s3 + $0xec8] sm:$0xff] }
 0x385   : > { %v1721_v62 = vadd.f32 %v1720_v59, %v1210_v57  ;;  %v587_v57 = vld [vmem:[%s2186_s3 + $0xdb0] sm:$0xff] }
 0x387   : > { %v1722_v3 = vadd.f32 %v1721_v62, %v1211_v60  ;;  %v1230_v60 = vsel %vm3819_vm6, %v586_v54, 0.0  ;;  %v605_v54 = vld [vmem:[%s2186_s3 + $0xe40] sm:$0xff] }
 0x389   : > { %v1723_v7 = vadd.f32 %v1722_v3, %v1212_v63  ;;  %v1231_v63 = vsel %vm3819_vm6, %v587_v57, 0.0  ;;  %v1248_v57 = vsel %vm3879_vm8, %v604_v51, 0.0  ;;  %v623_v51 = vld [vmem:[%s2186_s3 + $0xed0] sm:$0xff] }
 0x38b   : > { %v1724_v10 = vadd.f32 %v1723_v7, %v1213_v4 }
 0x38d   : > { %v1725_v14 = vadd.f32 %v1724_v10, %v1214_v8  ;;  %v1233_v8 = vsel %vm3849_vm7, %v589_v0, 0.0  ;;  %v608_v0 = vld [vmem:[%s2186_s3 + $0xe58] sm:$0xff] }
 0x38f   : > { %v1726_v17 = vadd.f32 %v1725_v14, %v1215_v11  ;;  %v1234_v11 = vsel %vm3849_vm7, %v590_v6, 0.0  ;;  %v1235_v14 = vsel %vm3849_vm7, %v591_v9, 0.0 }
 0x391   : > { %v1727_v20 = vadd.f32 %v1726_v17, %v1216_v15  ;;  %v593_v15 = vld [vmem:[%s2186_s3 + $0xde0] sm:$0xff]  ;;  %v1236_v17 = vsel %vm3849_vm7, %v592_v12, 0.0  ;;  %v722_v12 = vadd.s32 464, %v2194_v1 }
 0x393   : > { %v1728_v23 = vadd.f32 %v1727_v20, %v1217_v18  ;;  %v594_v18 = vld [vmem:[%s2186_s3 + $0xde8] sm:$0xff]  ;;  %v1237_v20 = vsel %vm3849_vm7, %v593_v15, 0.0  ;;  %v612_v15 = vld [vmem:[%s2186_s3 + $0xe78] sm:$0xff]  ;;  %vm3939_vm10 = vcmp.lt.s32.totalorder %v722_v12, %v2196_v2 }
 0x394   : > { %v630_v12 = vld [vmem:[%s2186_s3 + $0xf08] sm:$0xff] }
 0x395   : > { %v1729_v26 = vadd.f32 %v1728_v23, %v1218_v21  ;;  %v595_v21 = vld [vmem:[%s2186_s3 + $0xdf0] sm:$0xff] }
 0x397   : > { %v1730_v29 = vadd.f32 %v1729_v26, %v1219_v24  ;;  %v1238_v24 = vsel %vm3849_vm7, %v594_v18, 0.0  ;;  %v613_v18 = vld [vmem:[%s2186_s3 + $0xe80] sm:$0xff] }
 0x399   : > { %v1731_v33 = vadd.f32 %v1730_v29, %v1220_v27  ;;  %v1239_v27 = vsel %vm3849_vm7, %v595_v21, 0.0  ;;  %v1256_v21 = vsel %vm3909_vm9, %v612_v15, 0.0  ;;  %v631_v15 = vld [vmem:[%s2186_s3 + $0xf10] sm:$0xff] }
 0x39b   : > { %v1732_v36 = vadd.f32 %v1731_v33, %v1221_v30 }
 0x39d   : > { %v1733_v40 = vadd.f32 %v1732_v36, %v1222_v34  ;;  %v1241_v34 = vsel %vm3879_vm8, %v597_v28, 0.0  ;;  %v616_v28 = vld [vmem:[%s2186_s3 + $0xe98] sm:$0xff] }
 0x39f   : > { %v1734_v43 = vadd.f32 %v1733_v40, %v1223_v37  ;;  %v1242_v37 = vsel %vm3879_vm8, %v598_v32, 0.0  ;;  %v1243_v40 = vsel %vm3879_vm8, %v599_v35, 0.0 }
 0x3a1   : > { %v1735_v46 = vadd.f32 %v1734_v43, %v1224_v41  ;;  %v601_v41 = vld [vmem:[%s2186_s3 + $0xe20] sm:$0xff]  ;;  %v1244_v43 = vsel %vm3879_vm8, %v600_v38, 0.0  ;;  %v723_v38 = vadd.s32 472, %v2194_v1 }
 0x3a3   : > { %v1736_v49 = vadd.f32 %v1735_v46, %v1225_v44  ;;  %v602_v44 = vld [vmem:[%s2186_s3 + $0xe28] sm:$0xff]  ;;  %v1245_v46 = vsel %vm3879_vm8, %v601_v41, 0.0  ;;  %v620_v41 = vld [vmem:[%s2186_s3 + $0xeb8] sm:$0xff]  ;;  %vm3969_vm11 = vcmp.lt.s32.totalorder %v723_v38, %v2196_v2 }
 0x3a4   : > { %v638_v38 = vld [vmem:[%s2186_s3 + $0xf48] sm:$0xff] }
 0x3a5   : > { %v1737_v52 = vadd.f32 %v1736_v49, %v1226_v47  ;;  %v603_v47 = vld [vmem:[%s2186_s3 + $0xe30] sm:$0xff] }
 0x3a7   : > { %v1738_v55 = vadd.f32 %v1737_v52, %v1227_v50  ;;  %v1246_v50 = vsel %vm3879_vm8, %v602_v44, 0.0  ;;  %v621_v44 = vld [vmem:[%s2186_s3 + $0xec0] sm:$0xff] }
 0x3a9   : > { %v1739_v59 = vadd.f32 %v1738_v55, %v1228_v53  ;;  %v1247_v53 = vsel %vm3879_vm8, %v603_v47, 0.0  ;;  %v1264_v47 = vsel %vm3939_vm10, %v620_v41, 0.0  ;;  %v639_v41 = vld [vmem:[%s2186_s3 + $0xf50] sm:$0xff] }
 0x3ab   : > { %v1740_v62 = vadd.f32 %v1739_v59, %v1229_v56 }
 0x3ad   : > { %v1741_v4 = vadd.f32 %v1740_v62, %v1230_v60  ;;  %v1249_v60 = vsel %vm3909_vm9, %v605_v54, 0.0  ;;  %v624_v54 = vld [vmem:[%s2186_s3 + $0xed8] sm:$0xff] }
 0x3af   : > { %v1742_v7 = vadd.f32 %v1741_v4, %v1231_v63  ;;  %v1250_v63 = vsel %vm3909_vm9, %v606_v58, 0.0  ;;  %v1251_v4 = vsel %vm3909_vm9, %v607_v61, 0.0 }
 0x3b1   : > { %v1743_v10 = vadd.f32 %v1742_v7, %v1232_v5  ;;  %v609_v5 = vld [vmem:[%s2186_s3 + $0xe60] sm:$0xff]  ;;  %v1252_v7 = vsel %vm3909_vm9, %v608_v0, 0.0  ;;  %v724_v0 = vadd.s32 480, %v2194_v1 }
 0x3b3   : > { %v1744_v13 = vadd.f32 %v1743_v10, %v1233_v8  ;;  %v610_v8 = vld [vmem:[%s2186_s3 + $0xe68] sm:$0xff]  ;;  %v1253_v10 = vsel %vm3909_vm9, %v609_v5, 0.0  ;;  %v628_v5 = vld [vmem:[%s2186_s3 + $0xef8] sm:$0xff]  ;;  %vm3999_vm12 = vcmp.lt.s32.totalorder %v724_v0, %v2196_v2 }
 0x3b4   : > { %v646_v0 = vld [vmem:[%s2186_s3 + $0xf88] sm:$0xff] }
 0x3b5   : > { %v1745_v16 = vadd.f32 %v1744_v13, %v1234_v11  ;;  %v611_v11 = vld [vmem:[%s2186_s3 + $0xe70] sm:$0xff] }
 0x3b7   : > { %v1746_v19 = vadd.f32 %v1745_v16, %v1235_v14  ;;  %v1254_v14 = vsel %vm3909_vm9, %v610_v8, 0.0  ;;  %v629_v8 = vld [vmem:[%s2186_s3 + $0xf00] sm:$0xff] }
 0x3b9   : > { %v1747_v23 = vadd.f32 %v1746_v19, %v1236_v17  ;;  %v1255_v17 = vsel %vm3909_vm9, %v611_v11, 0.0  ;;  %v1272_v11 = vsel %vm3969_vm11, %v628_v5, 0.0  ;;  %v647_v5 = vld [vmem:[%s2186_s3 + $0xf90] sm:$0xff] }
 0x3bb   : > { %v1748_v26 = vadd.f32 %v1747_v23, %v1237_v20 }
 0x3bd   : > { %v1749_v30 = vadd.f32 %v1748_v26, %v1238_v24  ;;  %v1257_v24 = vsel %vm3939_vm10, %v613_v18, 0.0  ;;  %v632_v18 = vld [vmem:[%s2186_s3 + $0xf18] sm:$0xff] }
 0x3bf   : > { %v1750_v33 = vadd.f32 %v1749_v30, %v1239_v27  ;;  %v1258_v27 = vsel %vm3939_vm10, %v614_v22, 0.0  ;;  %v1259_v30 = vsel %vm3939_vm10, %v615_v25, 0.0 }
 0x3c1   : > { %v1751_v36 = vadd.f32 %v1750_v33, %v1240_v31  ;;  %v617_v31 = vld [vmem:[%s2186_s3 + $0xea0] sm:$0xff]  ;;  %v1260_v33 = vsel %vm3939_vm10, %v616_v28, 0.0  ;;  %v725_v28 = vadd.s32 488, %v2194_v1 }
 0x3c3   : > { %v1752_v39 = vadd.f32 %v1751_v36, %v1241_v34  ;;  %v618_v34 = vld [vmem:[%s2186_s3 + $0xea8] sm:$0xff]  ;;  %v1261_v36 = vsel %vm3939_vm10, %v617_v31, 0.0  ;;  %v636_v31 = vld [vmem:[%s2186_s3 + $0xf38] sm:$0xff]  ;;  %vm4029_vm13 = vcmp.lt.s32.totalorder %v725_v28, %v2196_v2 }
 0x3c5   : > { %v1753_v42 = vadd.f32 %v1752_v39, %v1242_v37  ;;  %v619_v37 = vld [vmem:[%s2186_s3 + $0xeb0] sm:$0xff] }
 0x3c7   : > { %v1754_v45 = vadd.f32 %v1753_v42, %v1243_v40  ;;  %v1262_v40 = vsel %vm3939_vm10, %v618_v34, 0.0  ;;  %v637_v34 = vld [vmem:[%s2186_s3 + $0xf40] sm:$0xff] }
 0x3c9   : > { %v1755_v49 = vadd.f32 %v1754_v45, %v1244_v43  ;;  %v1263_v43 = vsel %vm3939_vm10, %v619_v37, 0.0  ;;  %v1280_v37 = vsel %vm3999_vm12, %v636_v31, 0.0 }
 0x3cb   : > { %v1756_v52 = vadd.f32 %v1755_v49, %v1245_v46 }
 0x3cd   : > { %v1757_v56 = vadd.f32 %v1756_v52, %v1246_v50  ;;  %v1265_v50 = vsel %vm3969_vm11, %v621_v44, 0.0  ;;  %v640_v44 = vld [vmem:[%s2186_s3 + $0xf58] sm:$0xff] }
 0x3cf   : > { %v1758_v59 = vadd.f32 %v1757_v56, %v1247_v53  ;;  %v1266_v53 = vsel %vm3969_vm11, %v622_v48, 0.0  ;;  %v1267_v56 = vsel %vm3969_vm11, %v623_v51, 0.0 }
 0x3d1   : > { %v1759_v62 = vadd.f32 %v1758_v59, %v1248_v57  ;;  %v625_v57 = vld [vmem:[%s2186_s3 + $0xee0] sm:$0xff]  ;;  %v1268_v59 = vsel %vm3969_vm11, %v624_v54, 0.0  ;;  %v726_v54 = vadd.s32 496, %v2194_v1 }
 0x3d3   : > { %v1760_v3 = vadd.f32 %v1759_v62, %v1249_v60  ;;  %v626_v60 = vld [vmem:[%s2186_s3 + $0xee8] sm:$0xff]  ;;  %v1269_v62 = vsel %vm3969_vm11, %v625_v57, 0.0  ;;  %v644_v57 = vld [vmem:[%s2186_s3 + $0xf78] sm:$0xff]  ;;  %vm4059_vm14 = vcmp.lt.s32.totalorder %v726_v54, %v2196_v2 }
 0x3d5   : > { %v1761_v6 = vadd.f32 %v1760_v3, %v1250_v63  ;;  %v627_v63 = vld [vmem:[%s2186_s3 + $0xef0] sm:$0xff] }
 0x3d7   : > { %v1762_v9 = vadd.f32 %v1761_v6, %v1251_v4  ;;  %v1270_v4 = vsel %vm3969_vm11, %v626_v60, 0.0  ;;  %v645_v60 = vld [vmem:[%s2186_s3 + $0xf80] sm:$0xff] }
 0x3d9   : > { %v1763_v13 = vadd.f32 %v1762_v9, %v1252_v7  ;;  %v1271_v7 = vsel %vm3969_vm11, %v627_v63, 0.0  ;;  %v1288_v63 = vsel %vm4029_vm13, %v644_v57, 0.0 }
 0x3db   : > { %v1764_v16 = vadd.f32 %v1763_v13, %v1253_v10 }
 0x3dd   : > { %v1765_v20 = vadd.f32 %v1764_v16, %v1254_v14  ;;  %v1273_v14 = vsel %vm3999_vm12, %v629_v8, 0.0  ;;  %v648_v8 = vld [vmem:[%s2186_s3 + $0xf98] sm:$0xff] }
 0x3df   : > { %v1766_v23 = vadd.f32 %v1765_v20, %v1255_v17  ;;  %v1274_v17 = vsel %vm3999_vm12, %v630_v12, 0.0  ;;  %v1275_v20 = vsel %vm3999_vm12, %v631_v15, 0.0 }
 0x3e1   : > { %v1767_v26 = vadd.f32 %v1766_v23, %v1256_v21  ;;  %v633_v21 = vld [vmem:[%s2186_s3 + $0xf20] sm:$0xff]  ;;  %v1276_v23 = vsel %vm3999_vm12, %v632_v18, 0.0  ;;  %v727_v18 = vadd.s32 504, %v2194_v1 }
 0x3e3   : > { %v1768_v29 = vadd.f32 %v1767_v26, %v1257_v24  ;;  %v634_v24 = vld [vmem:[%s2186_s3 + $0xf28] sm:$0xff]  ;;  %v1277_v26 = vsel %vm3999_vm12, %v633_v21, 0.0  ;;  %v652_v21 = vld [vmem:[%s2186_s3 + $0xfb8] sm:$0xff]  ;;  %vm4089_vm15 = vcmp.lt.s32.totalorder %v727_v18, %v2196_v2 }
 0x3e4   : > { %v1296_v1 = vsel %vm4059_vm14, %v652_v21, 0.0  ;;  %v656_v2 = vld [vmem:[%s2186_s3 + $0xfd8] sm:$0xff] }
 0x3e5   : > { %v1769_v32 = vadd.f32 %v1768_v29, %v1258_v27  ;;  %v635_v27 = vld [vmem:[%s2186_s3 + $0xf30] sm:$0xff] }
 0x3e7   : > { %v1770_v35 = vadd.f32 %v1769_v32, %v1259_v30  ;;  %v1278_v30 = vsel %vm3999_vm12, %v634_v24, 0.0  ;;  %v653_v24 = vld [vmem:[%s2186_s3 + $0xfc0] sm:$0xff] }
 0x3e9   : > { %v1771_v39 = vadd.f32 %v1770_v35, %v1260_v33  ;;  %v1279_v33 = vsel %vm3999_vm12, %v635_v27, 0.0  ;;  %v654_v27 = vld [vmem:[%s2186_s3 + $0xfc8] sm:$0xff]  ;;  %v657_v35 = vld [vmem:[%s2186_s3 + $0xfe0] sm:$0xff] }
 0x3eb   : > { %v1772_v42 = vadd.f32 %v1771_v39, %v1261_v36 }
 0x3ed   : > { %v1773_v46 = vadd.f32 %v1772_v42, %v1262_v40  ;;  %v1281_v40 = vsel %vm4029_vm13, %v637_v34, 0.0 }
 0x3ef   : > { %v1774_v49 = vadd.f32 %v1773_v46, %v1263_v43  ;;  %v1282_v43 = vsel %vm4029_vm13, %v638_v38, 0.0  ;;  %v1283_v46 = vsel %vm4029_vm13, %v639_v41, 0.0  ;;  %v658_v38 = vld [vmem:[%s2186_s3 + $0xfe8] sm:$0xff]  ;;  %v659_v41 = vld [vmem:[%s2186_s3 + $0xff0] sm:$0xff] }
 0x3f1   : > { %v1775_v52 = vadd.f32 %v1774_v49, %v1264_v47  ;;  %v641_v47 = vld [vmem:[%s2186_s3 + $0xf60] sm:$0xff]  ;;  %v1284_v49 = vsel %vm4029_vm13, %v640_v44, 0.0  ;;  %v660_v44 = vld [vmem:[%s2186_s3 + $0xff8] sm:$0xff] }
 0x3f3   : > { %v1776_v55 = vadd.f32 %v1775_v52, %v1265_v50  ;;  %v642_v50 = vld [vmem:[%s2186_s3 + $0xf68] sm:$0xff]  ;;  %v1285_v52 = vsel %vm4029_vm13, %v641_v47, 0.0 }
 0x3f5   : > { %v1777_v58 = vadd.f32 %v1776_v55, %v1266_v53  ;;  %v643_v53 = vld [vmem:[%s2186_s3 + $0xf70] sm:$0xff] }
 0x3f7   : > { %v1778_v61 = vadd.f32 %v1777_v58, %v1267_v56  ;;  %v1286_v56 = vsel %vm4029_vm13, %v642_v50, 0.0 }
 0x3f9   : > { %v1779_v3 = vadd.f32 %v1778_v61, %v1268_v59  ;;  %v1287_v59 = vsel %vm4029_vm13, %v643_v53, 0.0 }
 0x3fb   : > { %v1780_v6 = vadd.f32 %v1779_v3, %v1269_v62 }
 0x3fd   : > { %v1781_v10 = vadd.f32 %v1780_v6, %v1270_v4  ;;  %v1289_v4 = vsel %vm4059_vm14, %v645_v60, 0.0 }
 0x3ff   : > { %v1782_v13 = vadd.f32 %v1781_v10, %v1271_v7  ;;  %v1290_v7 = vsel %vm4059_vm14, %v646_v0, 0.0  ;;  %v1291_v10 = vsel %vm4059_vm14, %v647_v5, 0.0 }
 0x401   : > { %v1783_v16 = vadd.f32 %v1782_v13, %v1272_v11  ;;  %v649_v11 = vld [vmem:[%s2186_s3 + $0xfa0] sm:$0xff]  ;;  %v1292_v13 = vsel %vm4059_vm14, %v648_v8, 0.0 }
 0x403   : > { %v1784_v19 = vadd.f32 %v1783_v16, %v1273_v14  ;;  %v650_v14 = vld [vmem:[%s2186_s3 + $0xfa8] sm:$0xff]  ;;  %v1293_v16 = vsel %vm4059_vm14, %v649_v11, 0.0 }
 0x405   : > { %v1785_v22 = vadd.f32 %v1784_v19, %v1274_v17  ;;  %v651_v17 = vld [vmem:[%s2186_s3 + $0xfb0] sm:$0xff] }
 0x407   : > { %v1786_v25 = vadd.f32 %v1785_v22, %v1275_v20  ;;  %v1294_v20 = vsel %vm4059_vm14, %v650_v14, 0.0 }
 0x409   : > { %v1787_v29 = vadd.f32 %v1786_v25, %v1276_v23  ;;  %v1295_v23 = vsel %vm4059_vm14, %v651_v17, 0.0 }
 0x40b   : > { %v1788_v32 = vadd.f32 %v1787_v29, %v1277_v26  ;;  %v1297_v29 = vsel %vm4089_vm15, %v653_v24, 0.0 }
 0x40d   : > { %v1789_v36 = vadd.f32 %v1788_v32, %v1278_v30  ;;  %v655_v30 = vld [vmem:[%s2186_s3 + $0xfd0] sm:$0xff]  ;;  %v1298_v32 = vsel %vm4089_vm15, %v654_v27, 0.0 }
 0x40e   : > { %v1299_v34 = vsel %vm4089_vm15, %v655_v30, 0.0 }
 0x40f   : > { %v1790_v39 = vadd.f32 %v1789_v36, %v1279_v33 }
 0x411   : > { %v1791_v42 = vadd.f32 %v1790_v39, %v1280_v37  ;;  %v1300_v37 = vsel %vm4089_vm15, %v656_v2, 0.0 }
 0x413   : > { %v1792_v45 = vadd.f32 %v1791_v42, %v1281_v40  ;;  %v1301_v40 = vsel %vm4089_vm15, %v657_v35, 0.0 }
 0x415   : > { %v1793_v48 = vadd.f32 %v1792_v45, %v1282_v43  ;;  %v1302_v43 = vsel %vm4089_vm15, %v658_v38, 0.0 }
 0x417   : > { %v1794_v51 = vadd.f32 %v1793_v48, %v1283_v46  ;;  %v1303_v46 = vsel %vm4089_vm15, %v659_v41, 0.0  ;;  %v1304_v48 = vsel %vm4089_vm15, %v660_v44, 0.0 }
 0x419   : > { %v1795_v55 = vadd.f32 %v1794_v51, %v1284_v49 }
 0x41b   : > { %v1796_v58 = vadd.f32 %v1795_v55, %v1285_v52 }
 0x41d   : > { %v1797_v62 = vadd.f32 %v1796_v58, %v1286_v56 }
 0x41f   : > { %v1798_v3 = vadd.f32 %v1797_v62, %v1287_v59 }
 0x421   : > { %v1799_v6 = vadd.f32 %v1798_v3, %v1288_v63 }
 0x423   : > { %v1800_v9 = vadd.f32 %v1799_v6, %v1289_v4 }
 0x425   : > { %v1801_v12 = vadd.f32 %v1800_v9, %v1290_v7 }
 0x427   : > { %v1802_v15 = vadd.f32 %v1801_v12, %v1291_v10 }
 0x429   : > { %v1803_v19 = vadd.f32 %v1802_v15, %v1292_v13 }
 0x42b   : > { %v1804_v22 = vadd.f32 %v1803_v19, %v1293_v16 }
 0x42d   : > { %v1805_v26 = vadd.f32 %v1804_v22, %v1294_v20 }
 0x42f   : > { %v1806_v28 = vadd.f32 %v1805_v26, %v1295_v23 }
 0x431   : > { %v1807_v31 = vadd.f32 %v1806_v28, %v1296_v1 }
 0x433   : > { %v1808_v33 = vadd.f32 %v1807_v31, %v1297_v29 }
 0x435   : > { %v1809_v36 = vadd.f32 %v1808_v33, %v1298_v32 }
 0x437   : > { %v1810_v39 = vadd.f32 %v1809_v36, %v1299_v34 }
 0x439   : > { %v1811_v42 = vadd.f32 %v1810_v39, %v1300_v37 }
 0x43b   : > { %v1812_v45 = vadd.f32 %v1811_v42, %v1301_v40 }
 0x43d   : > { %v1813_v47 = vadd.f32 %v1812_v45, %v1302_v43 }
 0x43f   : > { %v1814_v49 = vadd.f32 %v1813_v47, %v1303_v46 }
 0x441   : > { %v1815_v50 = vadd.f32 %v1814_v49, %v1304_v48 }
 0x443   : > { %1816 = vadd.xlane.f32.xlu0 %v1815_v50 }
 0x4cc   : > { %v1817_v51 = vpop.xlane.xlu0 %1816 }
 0x4cd   : > { %v1818_v52 = vrot.slane %v1817_v51, 4 }
 0x4cf   : > { %v1819_v53 = vadd.f32 %v1818_v52, %v1817_v51 }
 0x4d1   : > { %v1820_v54 = vrot.slane %v1819_v53, 2 }
 0x4d3   : > { %v1821_v55 = vadd.f32 %v1820_v54, %v1819_v53 }
 0x4d5   : > { %v1822_v56 = vrot.slane %v1821_v55, 1 }
 0x4d7   : > { %v1823_v57 = vadd.f32 %v1822_v56, %v1821_v55 }
 0x4d9   : > { %1933 = vpush %v1823_v57 }
 0x50a   : > { %s1934_s13 = spop %1933 }
 0x50b   : > { %v1825_v58 = vstv %s1934_s13 }
 0x50c   : > { %1826 = vst [vmem:[%s142_s30] sm:$0xff] %v1825_v58 }
 0x50d   : > { %2016 = shalt.err (!%p2013_p0)
}
 0x50e   : > { %s2017_s22 = scalar_lea.hbm %s4123_s11, 128  ;;  %s2021_s27 = scalar_lea.hbm %s4160_s1, 1152 }
 0x50f   : > { %p2018_p1 = scmp.ne.s32.totalorder %s4123_s11, %s2017_s22  ;;  %p2022_p4 = scmp.lt.s32.totalorder %s4123_s11, %s4160_s1 }
 0x510   : > { %p2023_p5 = scmp.lt.s32.totalorder %s2021_s27, %s2017_s22 }
 0x511   : > { %p2019_p3 = pnand %p2018_p1, %p2129_p9 }
 0x512   : > { %p2024_p7 = por %p2023_p5, %p2022_p4 }
 0x513   : > { %p2020_p2 = pneg %p2019_p3 }
 0x515   : > { %p2025_p6 = pnand %p2024_p7, %p2020_p2 }
 0x517   : > { %2028 = shalt.err (!%p2025_p6)
}
 0x518   : > { %1936 = dma.vmem_to_hbm [thread:$0]  (%p2129_p9), %s1842_s2, 128, %s4123_s11, %s1828_s14  }
 0x519 PF: > { %p1942_p10 = scmp.ge.s32.totalorder %s2067_s9, 2  ;;  %s1853_s3 = sand.u32 1, %s2055_s6  }
 0x51a   : > { %p4294_p13 = scmp.ne.s32.totalorder %s4164_s18, 0  ;;  %s1854_s23 = scalar_lea.sflag [#allocation4], %s1853_s3 }
 0x51c   : > { %p1939_p8 = pnand %p1942_p10, %p4294_p13 }
 0x51e   : > { %p1940_p11 = pneg %p1939_p8 }
 0x520   : > { %2050 = dma.done.wait (%p1940_p11), %s1854_s23, 128  }
 0x521   : > { %2052 = vsyncadd (%p1940_p11), %s1854_s23, 4294967168  ;;  %p14_p12 = scmp.ge.s32.totalorder %s2108_s12, 11   ;;  %s4295_s6 = smov %s2059_s7 }
 0x522   : > { %s4296_s7 = smov %s2063_s8  ;;  %s4297_s8 = smov %s2120_s15 }
 0x523   : > { %s4298_s9 = smov %s2108_s12  ;;  %16 = sbr.rel (!%p14_p12) target bundleno = 5 (0x5), region = 69 }
 0x528   :  { %1859 = vsyncpa [#allocation3], 1 }
 0x529   :  { %1861 = vsyncpa [#allocation3 + $0x1], 1 }
 0x52a   :  { %1862 = vsyncpa [#allocation4], 1 }
 0x52b   :  { %1864 = vsyncpa [#allocation4 + $0x1], 1 }

</bundles_post_ra>
